<compile_context>
chip_gen: v6e
topology: v6e:2x2x1
jax: 0.10.0
libtpu: 0.0.40
codegen_flags: <defaults>
</compile_context>

<pallas_src>
import math

import jax
import jax.numpy as jnp
from jax.experimental import pallas as pl
from jax.experimental.pallas import tpu as pltpu

# ------------------- representative model sizes (small) -------------------
B, S = 2, 16            # batch, sequence length
V = 128                 # vocab size
D = 128                 # hidden size (lane-dense)
NH, DH = 4, 32          # heads, head dim
F = 256                 # MLP hidden size
LN_EPS = 1e-5
SCALE = 1.0 / math.sqrt(DH)


def _layernorm(x, g, b):
    mean = jnp.mean(x, axis=-1, keepdims=True)
    xc = x - mean
    var = jnp.mean(xc * xc, axis=-1, keepdims=True)
    return xc * jax.lax.rsqrt(var + LN_EPS) * g + b


# ------------------------------ Pallas kernel ------------------------------
def _encoder_kernel(ids_ref, wemb_ref, pos_ref,
                    ln0g_ref, ln0b_ref,
                    wqkv_ref, bqkv_ref, wo_ref, bo_ref,
                    ln1g_ref, ln1b_ref,
                    w1_ref, b1_ref, w2_ref, b2_ref,
                    ln2g_ref, ln2b_ref,
                    out_ref):
    # ---- embedding lookup as a one-hot matmul (no gather) ----
    ids = ids_ref[0]                                            # [S, 1] int32
    iota_v = jax.lax.broadcasted_iota(jnp.int32, (S, V), 1)     # [S, V]
    onehot = jnp.where(iota_v == ids, 1.0, 0.0).astype(jnp.bfloat16)
    emb = jnp.dot(onehot, wemb_ref[...],
                  preferred_element_type=jnp.float32)           # [S, D] f32
    x = _layernorm(emb + pos_ref[...], ln0g_ref[...], ln0b_ref[...])

    # ---- multi-head self-attention (fused QKV projection) ----
    qkv = jnp.dot(x.astype(jnp.bfloat16), wqkv_ref[...],
                  preferred_element_type=jnp.float32) + bqkv_ref[...]
    q = qkv[:, 0:D] * SCALE          # fold attention scale into Q once
    k = qkv[:, D:2 * D]
    v = qkv[:, 2 * D:3 * D]

    attn_out = jnp.zeros((S, D), jnp.float32) + bo_ref[...]
    for h in range(NH):                                         # static unroll
        sl = slice(h * DH, (h + 1) * DH)
        qh = q[:, sl].astype(jnp.bfloat16)
        kh = k[:, sl].astype(jnp.bfloat16)
        vh = v[:, sl].astype(jnp.bfloat16)
        s = jax.lax.dot_general(qh, kh, (((1,), (1,)), ((), ())),
                                preferred_element_type=jnp.float32)   # [S, S]
        s = s - jnp.max(s, axis=-1, keepdims=True)              # stable softmax
        p = jnp.exp(s)
        p = p * pl.reciprocal(jnp.sum(p, axis=-1, keepdims=True), approx=True)
        ctx = jnp.dot(p.astype(jnp.bfloat16), vh,
                      preferred_element_type=jnp.float32)       # [S, DH]
        # output projection folded per head: ctx @ Wo == sum_h ctx_h @ Wo[h]
        attn_out = attn_out + jnp.dot(ctx.astype(jnp.bfloat16), wo_ref[sl, :],
                                      preferred_element_type=jnp.float32)

    x1 = _layernorm(x + attn_out, ln1g_ref[...], ln1b_ref[...])

    # ---- GELU MLP ----
    h1 = jnp.dot(x1.astype(jnp.bfloat16), w1_ref[...],
                 preferred_element_type=jnp.float32) + b1_ref[...]
    h1 = jax.nn.gelu(h1, approximate=True)
    h2 = jnp.dot(h1.astype(jnp.bfloat16), w2_ref[...],
                 preferred_element_type=jnp.float32) + b2_ref[...]

    out_ref[0] = _layernorm(x1 + h2, ln2g_ref[...], ln2b_ref[...]).astype(out_ref.dtype)


def _param_spec(shape):
    # whole-parameter block; same block index every grid step -> stays VMEM-resident
    return pl.BlockSpec(shape, lambda b: (0, 0))


@jax.jit
def hf_last_hidden_state(input_ids3, params):
    """Mirrors HugginFaceModel.forward(input_ids) -> last_hidden_state [B,S,D]."""
    p = params
    return pl.pallas_call(
        _encoder_kernel,
        grid=(B,),
        in_specs=[
            pl.BlockSpec((1, S, 1), lambda b: (b, 0, 0)),       # token ids
            _param_spec((V, D)),                                # word embeddings (bf16)
            _param_spec((S, D)),                                # position embeddings
            _param_spec((1, D)), _param_spec((1, D)),           # LN0 gamma/beta
            _param_spec((D, 3 * D)), _param_spec((1, 3 * D)),   # fused QKV w/b
            _param_spec((D, D)), _param_spec((1, D)),           # attn out proj w/b
            _param_spec((1, D)), _param_spec((1, D)),           # LN1 gamma/beta
            _param_spec((D, F)), _param_spec((1, F)),           # MLP in w/b
            _param_spec((F, D)), _param_spec((1, D)),           # MLP out w/b
            _param_spec((1, D)), _param_spec((1, D)),           # LN2 gamma/beta
        ],
        out_specs=pl.BlockSpec((1, S, D), lambda b: (b, 0, 0)),
        out_shape=jax.ShapeDtypeStruct((B, S, D), jnp.float32),
        compiler_params=pltpu.CompilerParams(
            dimension_semantics=("parallel",)),
    )(input_ids3,
      p["w_emb"], p["pos"],
      p["ln0_g"], p["ln0_b"],
      p["w_qkv"], p["b_qkv"], p["w_o"], p["b_o"],
      p["ln1_g"], p["ln1_b"],
      p["w_mlp1"], p["b_mlp1"], p["w_mlp2"], p["b_mlp2"],
      p["ln2_g"], p["ln2_b"])


# ---------------------- pure-JAX reference (same dtype flow) ----------------------
def _ref_forward(input_ids, p):
    emb = jnp.take(p["w_emb"], input_ids, axis=0).astype(jnp.float32)       # [B,S,D]
    x = _layernorm(emb + p["pos"][None], p["ln0_g"], p["ln0_b"])
    qkv = jnp.einsum("bsd,df->bsf", x.astype(jnp.bfloat16), p["w_qkv"],
                     preferred_element_type=jnp.float32) + p["b_qkv"]
    q = qkv[..., 0:D] * SCALE
    k = qkv[..., D:2 * D]
    v = qkv[..., 2 * D:3 * D]
    attn = jnp.zeros((B, S, D), jnp.float32) + p["b_o"]
    for h in range(NH):
        sl = slice(h * DH, (h + 1) * DH)
        qh, kh, vh = (t[..., sl].astype(jnp.bfloat16) for t in (q, k, v))
        s = jnp.einsum("bqd,bkd->bqk", qh, kh, preferred_element_type=jnp.float32)
        s = s - jnp.max(s, axis=-1, keepdims=True)
        pw = jnp.exp(s)
        pw = pw / jnp.sum(pw, axis=-1, keepdims=True)
        ctx = jnp.einsum("bqk,bkd->bqd", pw.astype(jnp.bfloat16), vh,
                         preferred_element_type=jnp.float32)
        attn = attn + jnp.einsum("bqd,df->bqf", ctx.astype(jnp.bfloat16),
                                 p["w_o"][sl, :], preferred_element_type=jnp.float32)
    x1 = _layernorm(x + attn, p["ln1_g"], p["ln1_b"])
    h1 = jnp.einsum("bsd,df->bsf", x1.astype(jnp.bfloat16), p["w_mlp1"],
                    preferred_element_type=jnp.float32) + p["b_mlp1"]
    h1 = jax.nn.gelu(h1, approximate=True)
    h2 = jnp.einsum("bsf,fd->bsd", h1.astype(jnp.bfloat16), p["w_mlp2"],
                    preferred_element_type=jnp.float32) + p["b_mlp2"]
    return _layernorm(x1 + h2, p["ln2_g"], p["ln2_b"])


# ----------------------------------- main -----------------------------------
if __name__ == "__main__":
    key = jax.random.PRNGKey(0)
    ks = jax.random.split(key, 12)

    def nrm(k, shape, scale=0.05):
        return scale * jax.random.normal(k, shape, jnp.float32)

    # deterministic synthetic "pretrained" weights + token ids
    input_ids = jax.random.randint(ks[0], (B, S), 0, V, dtype=jnp.int32)
    input_ids3 = input_ids.reshape(B, S, 1)

    params = {
        "w_emb":  nrm(ks[1], (V, D), 0.02).astype(jnp.bfloat16),
        "pos":    nrm(ks[2], (S, D), 0.02),
        "ln0_g":  jnp.ones((1, D), jnp.float32),
        "ln0_b":  jnp.zeros((1, D), jnp.float32),
        "w_qkv":  nrm(ks[3], (D, 3 * D)).astype(jnp.bfloat16),
        "b_qkv":  nrm(ks[4], (1, 3 * D)),
        "w_o":    nrm(ks[5], (D, D)).astype(jnp.bfloat16),
        "b_o":    nrm(ks[6], (1, D)),
        "ln1_g":  jnp.ones((1, D), jnp.float32),
        "ln1_b":  jnp.zeros((1, D), jnp.float32),
        "w_mlp1": nrm(ks[7], (D, F)).astype(jnp.bfloat16),
        "b_mlp1": nrm(ks[8], (1, F)),
        "w_mlp2": nrm(ks[9], (F, D)).astype(jnp.bfloat16),
        "b_mlp2": nrm(ks[10], (1, D)),
        "ln2_g":  jnp.ones((1, D), jnp.float32),
        "ln2_b":  jnp.zeros((1, D), jnp.float32),
    }

    last_hidden = hf_last_hidden_state(input_ids3, params)
    jax.block_until_ready(last_hidden)

    assert last_hidden.shape == (B, S, D)
    assert bool(jnp.all(jnp.isfinite(last_hidden)))

    # loose-tolerance correctness check vs. a pure-JAX reference with the same
    # bf16/f32 dtype flow (kernel uses EUP-approx reciprocal in softmax).
    ref = _ref_forward(input_ids, params)
    assert bool(jnp.allclose(last_hidden, ref, atol=5e-2, rtol=5e-2))

    print("KERNEL_OK")
</pallas_src>

<mosaic_0001>
module attributes {stable_mosaic.version = 11 : i64} {
  func.func @_encoder_kernel(%arg0: i32, %arg1: memref<1x16x1xi32, #tpu.memory_space<vmem>>, %arg2: memref<128x128xbf16, #tpu.memory_space<vmem>>, %arg3: memref<16x128xf32, #tpu.memory_space<vmem>>, %arg4: memref<1x128xf32, #tpu.memory_space<vmem>>, %arg5: memref<1x128xf32, #tpu.memory_space<vmem>>, %arg6: memref<128x384xbf16, #tpu.memory_space<vmem>>, %arg7: memref<1x384xf32, #tpu.memory_space<vmem>>, %arg8: memref<128x128xbf16, #tpu.memory_space<vmem>>, %arg9: memref<1x128xf32, #tpu.memory_space<vmem>>, %arg10: memref<1x128xf32, #tpu.memory_space<vmem>>, %arg11: memref<1x128xf32, #tpu.memory_space<vmem>>, %arg12: memref<128x256xbf16, #tpu.memory_space<vmem>>, %arg13: memref<1x256xf32, #tpu.memory_space<vmem>>, %arg14: memref<256x128xbf16, #tpu.memory_space<vmem>>, %arg15: memref<1x128xf32, #tpu.memory_space<vmem>>, %arg16: memref<1x128xf32, #tpu.memory_space<vmem>>, %arg17: memref<1x128xf32, #tpu.memory_space<vmem>>, %arg18: memref<1x16x128xf32, #tpu.memory_space<vmem>>) attributes {dimension_semantics = [#tpu.dimension_semantics<parallel>], iteration_bounds = array<i64: 2>, scalar_prefetch = 0 : i64, scratch_operands = 0 : i64, tpu.core_type = #tpu.core_type<tc>, window_params = [{transform_indices = @transform_0, window_bounds = array<i64: 1, 16, 1>}, {pipeline_mode = #tpu.pipeline_mode<synchronous>, transform_indices = @transform_1, window_bounds = array<i64: 128, 128>}, {pipeline_mode = #tpu.pipeline_mode<synchronous>, transform_indices = @transform_2, window_bounds = array<i64: 16, 128>}, {pipeline_mode = #tpu.pipeline_mode<synchronous>, transform_indices = @transform_3, window_bounds = array<i64: 1, 128>}, {pipeline_mode = #tpu.pipeline_mode<synchronous>, transform_indices = @transform_4, window_bounds = array<i64: 1, 128>}, {pipeline_mode = #tpu.pipeline_mode<synchronous>, transform_indices = @transform_5, window_bounds = array<i64: 128, 384>}, {pipeline_mode = #tpu.pipeline_mode<synchronous>, transform_indices = @transform_6, window_bounds = array<i64: 1, 384>}, {pipeline_mode = #tpu.pipeline_mode<synchronous>, transform_indices = @transform_7, window_bounds = array<i64: 128, 128>}, {pipeline_mode = #tpu.pipeline_mode<synchronous>, transform_indices = @transform_8, window_bounds = array<i64: 1, 128>}, {pipeline_mode = #tpu.pipeline_mode<synchronous>, transform_indices = @transform_9, window_bounds = array<i64: 1, 128>}, {pipeline_mode = #tpu.pipeline_mode<synchronous>, transform_indices = @transform_10, window_bounds = array<i64: 1, 128>}, {pipeline_mode = #tpu.pipeline_mode<synchronous>, transform_indices = @transform_11, window_bounds = array<i64: 128, 256>}, {pipeline_mode = #tpu.pipeline_mode<synchronous>, transform_indices = @transform_12, window_bounds = array<i64: 1, 256>}, {pipeline_mode = #tpu.pipeline_mode<synchronous>, transform_indices = @transform_13, window_bounds = array<i64: 256, 128>}, {pipeline_mode = #tpu.pipeline_mode<synchronous>, transform_indices = @transform_14, window_bounds = array<i64: 1, 128>}, {pipeline_mode = #tpu.pipeline_mode<synchronous>, transform_indices = @transform_15, window_bounds = array<i64: 1, 128>}, {pipeline_mode = #tpu.pipeline_mode<synchronous>, transform_indices = @transform_16, window_bounds = array<i64: 1, 128>}, {transform_indices = @transform_17, window_bounds = array<i64: 1, 16, 128>}]} {
    %c0 = arith.constant 0 : index
    %c0_0 = arith.constant 0 : index
    %c0_1 = arith.constant 0 : index
    %0 = vector.load %arg1[%c0, %c0_0, %c0_1] : memref<1x16x1xi32, #tpu.memory_space<vmem>>, vector<1x16x1xi32>
    %1 = vector.shape_cast %0 : vector<1x16x1xi32> to vector<16x1xi32>
    %2 = tpu.iota {dimensions = array<i32: 1>} : vector<16x128xi32>
    %3 = vector.broadcast %1 : vector<16x1xi32> to vector<16x128xi32>
    %4 = arith.cmpi eq, %2, %3 : vector<16x128xi32>
    %cst = arith.constant 1.000000e+00 : f32
    %cst_2 = arith.constant 0.000000e+00 : f32
    %5 = vector.broadcast %cst : f32 to vector<16x128xf32>
    %6 = vector.broadcast %cst_2 : f32 to vector<16x128xf32>
    %7 = arith.select %4, %5, %6 : vector<16x128xi1>, vector<16x128xf32>
    %8 = arith.truncf %7 : vector<16x128xf32> to vector<16x128xbf16>
    %c0_3 = arith.constant 0 : index
    %c0_4 = arith.constant 0 : index
    %9 = vector.load %arg2[%c0_3, %c0_4] : memref<128x128xbf16, #tpu.memory_space<vmem>>, vector<128x128xbf16>
    %cst_5 = arith.constant dense<0.000000e+00> : vector<16x128xf32>
    %10 = tpu.matmul %8, %9, %cst_5 {dimension_numbers = #tpu.dot_dimension_numbers<[1], [0], [0], [1], [0, 0, 1, 1], [], []>} : vector<16x128xbf16>, vector<128x128xbf16>, vector<16x128xf32> -> vector<16x128xf32>
    %c0_6 = arith.constant 0 : index
    %c0_7 = arith.constant 0 : index
    %11 = vector.load %arg3[%c0_6, %c0_7] : memref<16x128xf32, #tpu.memory_space<vmem>>, vector<16x128xf32>
    %12 = arith.addf %10, %11 : vector<16x128xf32>
    %c0_8 = arith.constant 0 : index
    %c0_9 = arith.constant 0 : index
    %13 = vector.load %arg4[%c0_8, %c0_9] : memref<1x128xf32, #tpu.memory_space<vmem>>, vector<1x128xf32>
    %c0_10 = arith.constant 0 : index
    %c0_11 = arith.constant 0 : index
    %14 = vector.load %arg5[%c0_10, %c0_11] : memref<1x128xf32, #tpu.memory_space<vmem>>, vector<1x128xf32>
    %cst_12 = arith.constant dense<0.000000e+00> : vector<16xf32>
    %15 = vector.multi_reduction <add>, %12, %cst_12 [1] : vector<16x128xf32> to vector<16xf32>
    %16 = vector.shape_cast %15 : vector<16xf32> to vector<16x1xf32>
    %cst_13 = arith.constant 1.280000e+02 : f32
    %17 = vector.broadcast %cst_13 : f32 to vector<16x1xf32>
    %18 = arith.divf %16, %17 : vector<16x1xf32>
    %19 = vector.broadcast %18 : vector<16x1xf32> to vector<16x128xf32>
    %20 = arith.subf %12, %19 : vector<16x128xf32>
    %21 = arith.mulf %20, %20 : vector<16x128xf32>
    %cst_14 = arith.constant dense<0.000000e+00> : vector<16xf32>
    %22 = vector.multi_reduction <add>, %21, %cst_14 [1] : vector<16x128xf32> to vector<16xf32>
    %23 = vector.shape_cast %22 : vector<16xf32> to vector<16x1xf32>
    %cst_15 = arith.constant 1.280000e+02 : f32
    %24 = vector.broadcast %cst_15 : f32 to vector<16x1xf32>
    %25 = arith.divf %23, %24 : vector<16x1xf32>
    %cst_16 = arith.constant 9.99999974E-6 : f32
    %26 = vector.broadcast %cst_16 : f32 to vector<16x1xf32>
    %27 = arith.addf %25, %26 : vector<16x1xf32>
    %28 = math.rsqrt %27 : vector<16x1xf32>
    %29 = vector.broadcast %28 : vector<16x1xf32> to vector<16x128xf32>
    %30 = arith.mulf %20, %29 : vector<16x128xf32>
    %31 = vector.broadcast %13 : vector<1x128xf32> to vector<16x128xf32>
    %32 = arith.mulf %30, %31 : vector<16x128xf32>
    %33 = vector.broadcast %14 : vector<1x128xf32> to vector<16x128xf32>
    %34 = arith.addf %32, %33 : vector<16x128xf32>
    %35 = arith.truncf %34 : vector<16x128xf32> to vector<16x128xbf16>
    %c0_17 = arith.constant 0 : index
    %c0_18 = arith.constant 0 : index
    %36 = vector.load %arg6[%c0_17, %c0_18] : memref<128x384xbf16, #tpu.memory_space<vmem>>, vector<128x384xbf16>
    %cst_19 = arith.constant dense<0.000000e+00> : vector<16x384xf32>
    %37 = tpu.matmul %35, %36, %cst_19 {dimension_numbers = #tpu.dot_dimension_numbers<[1], [0], [0], [1], [0, 0, 1, 1], [], []>} : vector<16x128xbf16>, vector<128x384xbf16>, vector<16x384xf32> -> vector<16x384xf32>
    %c0_20 = arith.constant 0 : index
    %c0_21 = arith.constant 0 : index
    %38 = vector.load %arg7[%c0_20, %c0_21] : memref<1x384xf32, #tpu.memory_space<vmem>>, vector<1x384xf32>
    %39 = vector.broadcast %38 : vector<1x384xf32> to vector<16x384xf32>
    %40 = arith.addf %37, %39 : vector<16x384xf32>
    %41 = vector.extract_strided_slice %40 {offsets = [0, 0], sizes = [16, 128], strides = [1, 1]} : vector<16x384xf32> to vector<16x128xf32>
    %cst_22 = arith.constant 0.176776692 : f32
    %42 = vector.broadcast %cst_22 : f32 to vector<16x128xf32>
    %43 = arith.mulf %41, %42 : vector<16x128xf32>
    %44 = vector.extract_strided_slice %40 {offsets = [0, 128], sizes = [16, 128], strides = [1, 1]} : vector<16x384xf32> to vector<16x128xf32>
    %45 = vector.extract_strided_slice %40 {offsets = [0, 256], sizes = [16, 128], strides = [1, 1]} : vector<16x384xf32> to vector<16x128xf32>
    %cst_23 = arith.constant 0.000000e+00 : f32
    %46 = vector.broadcast %cst_23 : f32 to vector<16x128xf32>
    %c0_24 = arith.constant 0 : index
    %c0_25 = arith.constant 0 : index
    %47 = vector.load %arg9[%c0_24, %c0_25] : memref<1x128xf32, #tpu.memory_space<vmem>>, vector<1x128xf32>
    %48 = vector.broadcast %47 : vector<1x128xf32> to vector<16x128xf32>
    %49 = arith.addf %46, %48 : vector<16x128xf32>
    %50 = vector.extract_strided_slice %43 {offsets = [0, 0], sizes = [16, 32], strides = [1, 1]} : vector<16x128xf32> to vector<16x32xf32>
    %51 = arith.truncf %50 : vector<16x32xf32> to vector<16x32xbf16>
    %52 = vector.extract_strided_slice %44 {offsets = [0, 0], sizes = [16, 32], strides = [1, 1]} : vector<16x128xf32> to vector<16x32xf32>
    %53 = arith.truncf %52 : vector<16x32xf32> to vector<16x32xbf16>
    %54 = vector.extract_strided_slice %45 {offsets = [0, 0], sizes = [16, 32], strides = [1, 1]} : vector<16x128xf32> to vector<16x32xf32>
    %55 = arith.truncf %54 : vector<16x32xf32> to vector<16x32xbf16>
    %cst_26 = arith.constant dense<0.000000e+00> : vector<16x16xf32>
    %56 = tpu.matmul %51, %53, %cst_26 {dimension_numbers = #tpu.dot_dimension_numbers<[1], [1], [0], [0], [0, 0, 1, 0], [], []>} : vector<16x32xbf16>, vector<16x32xbf16>, vector<16x16xf32> -> vector<16x16xf32>
    %cst_27 = arith.constant dense<0xFF800000> : vector<16xf32>
    %57 = vector.multi_reduction <maximumf>, %56, %cst_27 [1] : vector<16x16xf32> to vector<16xf32>
    %58 = vector.shape_cast %57 : vector<16xf32> to vector<16x1xf32>
    %59 = vector.broadcast %58 : vector<16x1xf32> to vector<16x16xf32>
    %60 = arith.subf %56, %59 : vector<16x16xf32>
    %61 = math.exp %60 : vector<16x16xf32>
    %cst_28 = arith.constant dense<0.000000e+00> : vector<16xf32>
    %62 = vector.multi_reduction <add>, %61, %cst_28 [1] : vector<16x16xf32> to vector<16xf32>
    %63 = vector.shape_cast %62 : vector<16xf32> to vector<16x1xf32>
    %64 = tpu.reciprocal %63 {approx = true} : vector<16x1xf32> -> vector<16x1xf32>
    %65 = vector.broadcast %64 : vector<16x1xf32> to vector<16x16xf32>
    %66 = arith.mulf %61, %65 : vector<16x16xf32>
    %67 = arith.truncf %66 : vector<16x16xf32> to vector<16x16xbf16>
    %cst_29 = arith.constant dense<0.000000e+00> : vector<16x32xf32>
    %68 = tpu.matmul %67, %55, %cst_29 {dimension_numbers = #tpu.dot_dimension_numbers<[1], [0], [0], [1], [0, 0, 1, 1], [], []>} : vector<16x16xbf16>, vector<16x32xbf16>, vector<16x32xf32> -> vector<16x32xf32>
    %69 = arith.truncf %68 : vector<16x32xf32> to vector<16x32xbf16>
    %c0_30 = arith.constant 0 : index
    %c0_31 = arith.constant 0 : index
    %70 = vector.load %arg8[%c0_30, %c0_31] : memref<128x128xbf16, #tpu.memory_space<vmem>>, vector<32x128xbf16>
    %cst_32 = arith.constant dense<0.000000e+00> : vector<16x128xf32>
    %71 = tpu.matmul %69, %70, %cst_32 {dimension_numbers = #tpu.dot_dimension_numbers<[1], [0], [0], [1], [0, 0, 1, 1], [], []>} : vector<16x32xbf16>, vector<32x128xbf16>, vector<16x128xf32> -> vector<16x128xf32>
    %72 = arith.addf %49, %71 : vector<16x128xf32>
    %73 = vector.extract_strided_slice %43 {offsets = [0, 32], sizes = [16, 32], strides = [1, 1]} : vector<16x128xf32> to vector<16x32xf32>
    %74 = arith.truncf %73 : vector<16x32xf32> to vector<16x32xbf16>
    %75 = vector.extract_strided_slice %44 {offsets = [0, 32], sizes = [16, 32], strides = [1, 1]} : vector<16x128xf32> to vector<16x32xf32>
    %76 = arith.truncf %75 : vector<16x32xf32> to vector<16x32xbf16>
    %77 = vector.extract_strided_slice %45 {offsets = [0, 32], sizes = [16, 32], strides = [1, 1]} : vector<16x128xf32> to vector<16x32xf32>
    %78 = arith.truncf %77 : vector<16x32xf32> to vector<16x32xbf16>
    %cst_33 = arith.constant dense<0.000000e+00> : vector<16x16xf32>
    %79 = tpu.matmul %74, %76, %cst_33 {dimension_numbers = #tpu.dot_dimension_numbers<[1], [1], [0], [0], [0, 0, 1, 0], [], []>} : vector<16x32xbf16>, vector<16x32xbf16>, vector<16x16xf32> -> vector<16x16xf32>
    %cst_34 = arith.constant dense<0xFF800000> : vector<16xf32>
    %80 = vector.multi_reduction <maximumf>, %79, %cst_34 [1] : vector<16x16xf32> to vector<16xf32>
    %81 = vector.shape_cast %80 : vector<16xf32> to vector<16x1xf32>
    %82 = vector.broadcast %81 : vector<16x1xf32> to vector<16x16xf32>
    %83 = arith.subf %79, %82 : vector<16x16xf32>
    %84 = math.exp %83 : vector<16x16xf32>
    %cst_35 = arith.constant dense<0.000000e+00> : vector<16xf32>
    %85 = vector.multi_reduction <add>, %84, %cst_35 [1] : vector<16x16xf32> to vector<16xf32>
    %86 = vector.shape_cast %85 : vector<16xf32> to vector<16x1xf32>
    %87 = tpu.reciprocal %86 {approx = true} : vector<16x1xf32> -> vector<16x1xf32>
    %88 = vector.broadcast %87 : vector<16x1xf32> to vector<16x16xf32>
    %89 = arith.mulf %84, %88 : vector<16x16xf32>
    %90 = arith.truncf %89 : vector<16x16xf32> to vector<16x16xbf16>
    %cst_36 = arith.constant dense<0.000000e+00> : vector<16x32xf32>
    %91 = tpu.matmul %90, %78, %cst_36 {dimension_numbers = #tpu.dot_dimension_numbers<[1], [0], [0], [1], [0, 0, 1, 1], [], []>} : vector<16x16xbf16>, vector<16x32xbf16>, vector<16x32xf32> -> vector<16x32xf32>
    %92 = arith.truncf %91 : vector<16x32xf32> to vector<16x32xbf16>
    %c32 = arith.constant 32 : index
    %c0_37 = arith.constant 0 : index
    %93 = vector.load %arg8[%c32, %c0_37] : memref<128x128xbf16, #tpu.memory_space<vmem>>, vector<32x128xbf16>
    %cst_38 = arith.constant dense<0.000000e+00> : vector<16x128xf32>
    %94 = tpu.matmul %92, %93, %cst_38 {dimension_numbers = #tpu.dot_dimension_numbers<[1], [0], [0], [1], [0, 0, 1, 1], [], []>} : vector<16x32xbf16>, vector<32x128xbf16>, vector<16x128xf32> -> vector<16x128xf32>
    %95 = arith.addf %72, %94 : vector<16x128xf32>
    %96 = vector.extract_strided_slice %43 {offsets = [0, 64], sizes = [16, 32], strides = [1, 1]} : vector<16x128xf32> to vector<16x32xf32>
    %97 = arith.truncf %96 : vector<16x32xf32> to vector<16x32xbf16>
    %98 = vector.extract_strided_slice %44 {offsets = [0, 64], sizes = [16, 32], strides = [1, 1]} : vector<16x128xf32> to vector<16x32xf32>
    %99 = arith.truncf %98 : vector<16x32xf32> to vector<16x32xbf16>
    %100 = vector.extract_strided_slice %45 {offsets = [0, 64], sizes = [16, 32], strides = [1, 1]} : vector<16x128xf32> to vector<16x32xf32>
    %101 = arith.truncf %100 : vector<16x32xf32> to vector<16x32xbf16>
    %cst_39 = arith.constant dense<0.000000e+00> : vector<16x16xf32>
    %102 = tpu.matmul %97, %99, %cst_39 {dimension_numbers = #tpu.dot_dimension_numbers<[1], [1], [0], [0], [0, 0, 1, 0], [], []>} : vector<16x32xbf16>, vector<16x32xbf16>, vector<16x16xf32> -> vector<16x16xf32>
    %cst_40 = arith.constant dense<0xFF800000> : vector<16xf32>
    %103 = vector.multi_reduction <maximumf>, %102, %cst_40 [1] : vector<16x16xf32> to vector<16xf32>
    %104 = vector.shape_cast %103 : vector<16xf32> to vector<16x1xf32>
    %105 = vector.broadcast %104 : vector<16x1xf32> to vector<16x16xf32>
    %106 = arith.subf %102, %105 : vector<16x16xf32>
    %107 = math.exp %106 : vector<16x16xf32>
    %cst_41 = arith.constant dense<0.000000e+00> : vector<16xf32>
    %108 = vector.multi_reduction <add>, %107, %cst_41 [1] : vector<16x16xf32> to vector<16xf32>
    %109 = vector.shape_cast %108 : vector<16xf32> to vector<16x1xf32>
    %110 = tpu.reciprocal %109 {approx = true} : vector<16x1xf32> -> vector<16x1xf32>
    %111 = vector.broadcast %110 : vector<16x1xf32> to vector<16x16xf32>
    %112 = arith.mulf %107, %111 : vector<16x16xf32>
    %113 = arith.truncf %112 : vector<16x16xf32> to vector<16x16xbf16>
    %cst_42 = arith.constant dense<0.000000e+00> : vector<16x32xf32>
    %114 = tpu.matmul %113, %101, %cst_42 {dimension_numbers = #tpu.dot_dimension_numbers<[1], [0], [0], [1], [0, 0, 1, 1], [], []>} : vector<16x16xbf16>, vector<16x32xbf16>, vector<16x32xf32> -> vector<16x32xf32>
    %115 = arith.truncf %114 : vector<16x32xf32> to vector<16x32xbf16>
    %c64 = arith.constant 64 : index
    %c0_43 = arith.constant 0 : index
    %116 = vector.load %arg8[%c64, %c0_43] : memref<128x128xbf16, #tpu.memory_space<vmem>>, vector<32x128xbf16>
    %cst_44 = arith.constant dense<0.000000e+00> : vector<16x128xf32>
    %117 = tpu.matmul %115, %116, %cst_44 {dimension_numbers = #tpu.dot_dimension_numbers<[1], [0], [0], [1], [0, 0, 1, 1], [], []>} : vector<16x32xbf16>, vector<32x128xbf16>, vector<16x128xf32> -> vector<16x128xf32>
    %118 = arith.addf %95, %117 : vector<16x128xf32>
    %119 = vector.extract_strided_slice %43 {offsets = [0, 96], sizes = [16, 32], strides = [1, 1]} : vector<16x128xf32> to vector<16x32xf32>
    %120 = arith.truncf %119 : vector<16x32xf32> to vector<16x32xbf16>
    %121 = vector.extract_strided_slice %44 {offsets = [0, 96], sizes = [16, 32], strides = [1, 1]} : vector<16x128xf32> to vector<16x32xf32>
    %122 = arith.truncf %121 : vector<16x32xf32> to vector<16x32xbf16>
    %123 = vector.extract_strided_slice %45 {offsets = [0, 96], sizes = [16, 32], strides = [1, 1]} : vector<16x128xf32> to vector<16x32xf32>
    %124 = arith.truncf %123 : vector<16x32xf32> to vector<16x32xbf16>
    %cst_45 = arith.constant dense<0.000000e+00> : vector<16x16xf32>
    %125 = tpu.matmul %120, %122, %cst_45 {dimension_numbers = #tpu.dot_dimension_numbers<[1], [1], [0], [0], [0, 0, 1, 0], [], []>} : vector<16x32xbf16>, vector<16x32xbf16>, vector<16x16xf32> -> vector<16x16xf32>
    %cst_46 = arith.constant dense<0xFF800000> : vector<16xf32>
    %126 = vector.multi_reduction <maximumf>, %125, %cst_46 [1] : vector<16x16xf32> to vector<16xf32>
    %127 = vector.shape_cast %126 : vector<16xf32> to vector<16x1xf32>
    %128 = vector.broadcast %127 : vector<16x1xf32> to vector<16x16xf32>
    %129 = arith.subf %125, %128 : vector<16x16xf32>
    %130 = math.exp %129 : vector<16x16xf32>
    %cst_47 = arith.constant dense<0.000000e+00> : vector<16xf32>
    %131 = vector.multi_reduction <add>, %130, %cst_47 [1] : vector<16x16xf32> to vector<16xf32>
    %132 = vector.shape_cast %131 : vector<16xf32> to vector<16x1xf32>
    %133 = tpu.reciprocal %132 {approx = true} : vector<16x1xf32> -> vector<16x1xf32>
    %134 = vector.broadcast %133 : vector<16x1xf32> to vector<16x16xf32>
    %135 = arith.mulf %130, %134 : vector<16x16xf32>
    %136 = arith.truncf %135 : vector<16x16xf32> to vector<16x16xbf16>
    %cst_48 = arith.constant dense<0.000000e+00> : vector<16x32xf32>
    %137 = tpu.matmul %136, %124, %cst_48 {dimension_numbers = #tpu.dot_dimension_numbers<[1], [0], [0], [1], [0, 0, 1, 1], [], []>} : vector<16x16xbf16>, vector<16x32xbf16>, vector<16x32xf32> -> vector<16x32xf32>
    %138 = arith.truncf %137 : vector<16x32xf32> to vector<16x32xbf16>
    %c96 = arith.constant 96 : index
    %c0_49 = arith.constant 0 : index
    %139 = vector.load %arg8[%c96, %c0_49] : memref<128x128xbf16, #tpu.memory_space<vmem>>, vector<32x128xbf16>
    %cst_50 = arith.constant dense<0.000000e+00> : vector<16x128xf32>
    %140 = tpu.matmul %138, %139, %cst_50 {dimension_numbers = #tpu.dot_dimension_numbers<[1], [0], [0], [1], [0, 0, 1, 1], [], []>} : vector<16x32xbf16>, vector<32x128xbf16>, vector<16x128xf32> -> vector<16x128xf32>
    %141 = arith.addf %118, %140 : vector<16x128xf32>
    %142 = arith.addf %34, %141 : vector<16x128xf32>
    %c0_51 = arith.constant 0 : index
    %c0_52 = arith.constant 0 : index
    %143 = vector.load %arg10[%c0_51, %c0_52] : memref<1x128xf32, #tpu.memory_space<vmem>>, vector<1x128xf32>
    %c0_53 = arith.constant 0 : index
    %c0_54 = arith.constant 0 : index
    %144 = vector.load %arg11[%c0_53, %c0_54] : memref<1x128xf32, #tpu.memory_space<vmem>>, vector<1x128xf32>
    %cst_55 = arith.constant dense<0.000000e+00> : vector<16xf32>
    %145 = vector.multi_reduction <add>, %142, %cst_55 [1] : vector<16x128xf32> to vector<16xf32>
    %146 = vector.shape_cast %145 : vector<16xf32> to vector<16x1xf32>
    %cst_56 = arith.constant 1.280000e+02 : f32
    %147 = vector.broadcast %cst_56 : f32 to vector<16x1xf32>
    %148 = arith.divf %146, %147 : vector<16x1xf32>
    %149 = vector.broadcast %148 : vector<16x1xf32> to vector<16x128xf32>
    %150 = arith.subf %142, %149 : vector<16x128xf32>
    %151 = arith.mulf %150, %150 : vector<16x128xf32>
    %cst_57 = arith.constant dense<0.000000e+00> : vector<16xf32>
    %152 = vector.multi_reduction <add>, %151, %cst_57 [1] : vector<16x128xf32> to vector<16xf32>
    %153 = vector.shape_cast %152 : vector<16xf32> to vector<16x1xf32>
    %cst_58 = arith.constant 1.280000e+02 : f32
    %154 = vector.broadcast %cst_58 : f32 to vector<16x1xf32>
    %155 = arith.divf %153, %154 : vector<16x1xf32>
    %cst_59 = arith.constant 9.99999974E-6 : f32
    %156 = vector.broadcast %cst_59 : f32 to vector<16x1xf32>
    %157 = arith.addf %155, %156 : vector<16x1xf32>
    %158 = math.rsqrt %157 : vector<16x1xf32>
    %159 = vector.broadcast %158 : vector<16x1xf32> to vector<16x128xf32>
    %160 = arith.mulf %150, %159 : vector<16x128xf32>
    %161 = vector.broadcast %143 : vector<1x128xf32> to vector<16x128xf32>
    %162 = arith.mulf %160, %161 : vector<16x128xf32>
    %163 = vector.broadcast %144 : vector<1x128xf32> to vector<16x128xf32>
    %164 = arith.addf %162, %163 : vector<16x128xf32>
    %165 = arith.truncf %164 : vector<16x128xf32> to vector<16x128xbf16>
    %c0_60 = arith.constant 0 : index
    %c0_61 = arith.constant 0 : index
    %166 = vector.load %arg12[%c0_60, %c0_61] : memref<128x256xbf16, #tpu.memory_space<vmem>>, vector<128x256xbf16>
    %cst_62 = arith.constant dense<0.000000e+00> : vector<16x256xf32>
    %167 = tpu.matmul %165, %166, %cst_62 {dimension_numbers = #tpu.dot_dimension_numbers<[1], [0], [0], [1], [0, 0, 1, 1], [], []>} : vector<16x128xbf16>, vector<128x256xbf16>, vector<16x256xf32> -> vector<16x256xf32>
    %c0_63 = arith.constant 0 : index
    %c0_64 = arith.constant 0 : index
    %168 = vector.load %arg13[%c0_63, %c0_64] : memref<1x256xf32, #tpu.memory_space<vmem>>, vector<1x256xf32>
    %169 = vector.broadcast %168 : vector<1x256xf32> to vector<16x256xf32>
    %170 = arith.addf %167, %169 : vector<16x256xf32>
    %171 = arith.mulf %170, %170 : vector<16x256xf32>
    %172 = arith.mulf %170, %171 : vector<16x256xf32>
    %cst_65 = arith.constant 4.471500e-02 : f32
    %173 = vector.broadcast %cst_65 : f32 to vector<16x256xf32>
    %174 = arith.mulf %173, %172 : vector<16x256xf32>
    %175 = arith.addf %170, %174 : vector<16x256xf32>
    %cst_66 = arith.constant 0.797884583 : f32
    %176 = vector.broadcast %cst_66 : f32 to vector<16x256xf32>
    %177 = arith.mulf %176, %175 : vector<16x256xf32>
    %178 = math.tanh %177 : vector<16x256xf32>
    %cst_67 = arith.constant 1.000000e+00 : f32
    %179 = vector.broadcast %cst_67 : f32 to vector<16x256xf32>
    %180 = arith.addf %179, %178 : vector<16x256xf32>
    %cst_68 = arith.constant 5.000000e-01 : f32
    %181 = vector.broadcast %cst_68 : f32 to vector<16x256xf32>
    %182 = arith.mulf %181, %180 : vector<16x256xf32>
    %183 = arith.mulf %170, %182 : vector<16x256xf32>
    %184 = arith.truncf %183 : vector<16x256xf32> to vector<16x256xbf16>
    %c0_69 = arith.constant 0 : index
    %c0_70 = arith.constant 0 : index
    %185 = vector.load %arg14[%c0_69, %c0_70] : memref<256x128xbf16, #tpu.memory_space<vmem>>, vector<256x128xbf16>
    %cst_71 = arith.constant dense<0.000000e+00> : vector<16x128xf32>
    %186 = tpu.matmul %184, %185, %cst_71 {dimension_numbers = #tpu.dot_dimension_numbers<[1], [0], [0], [1], [0, 0, 1, 1], [], []>} : vector<16x256xbf16>, vector<256x128xbf16>, vector<16x128xf32> -> vector<16x128xf32>
    %c0_72 = arith.constant 0 : index
    %c0_73 = arith.constant 0 : index
    %187 = vector.load %arg15[%c0_72, %c0_73] : memref<1x128xf32, #tpu.memory_space<vmem>>, vector<1x128xf32>
    %188 = vector.broadcast %187 : vector<1x128xf32> to vector<16x128xf32>
    %189 = arith.addf %186, %188 : vector<16x128xf32>
    %190 = arith.addf %164, %189 : vector<16x128xf32>
    %c0_74 = arith.constant 0 : index
    %c0_75 = arith.constant 0 : index
    %191 = vector.load %arg16[%c0_74, %c0_75] : memref<1x128xf32, #tpu.memory_space<vmem>>, vector<1x128xf32>
    %c0_76 = arith.constant 0 : index
    %c0_77 = arith.constant 0 : index
    %192 = vector.load %arg17[%c0_76, %c0_77] : memref<1x128xf32, #tpu.memory_space<vmem>>, vector<1x128xf32>
    %cst_78 = arith.constant dense<0.000000e+00> : vector<16xf32>
    %193 = vector.multi_reduction <add>, %190, %cst_78 [1] : vector<16x128xf32> to vector<16xf32>
    %194 = vector.shape_cast %193 : vector<16xf32> to vector<16x1xf32>
    %cst_79 = arith.constant 1.280000e+02 : f32
    %195 = vector.broadcast %cst_79 : f32 to vector<16x1xf32>
    %196 = arith.divf %194, %195 : vector<16x1xf32>
    %197 = vector.broadcast %196 : vector<16x1xf32> to vector<16x128xf32>
    %198 = arith.subf %190, %197 : vector<16x128xf32>
    %199 = arith.mulf %198, %198 : vector<16x128xf32>
    %cst_80 = arith.constant dense<0.000000e+00> : vector<16xf32>
    %200 = vector.multi_reduction <add>, %199, %cst_80 [1] : vector<16x128xf32> to vector<16xf32>
    %201 = vector.shape_cast %200 : vector<16xf32> to vector<16x1xf32>
    %cst_81 = arith.constant 1.280000e+02 : f32
    %202 = vector.broadcast %cst_81 : f32 to vector<16x1xf32>
    %203 = arith.divf %201, %202 : vector<16x1xf32>
    %cst_82 = arith.constant 9.99999974E-6 : f32
    %204 = vector.broadcast %cst_82 : f32 to vector<16x1xf32>
    %205 = arith.addf %203, %204 : vector<16x1xf32>
    %206 = math.rsqrt %205 : vector<16x1xf32>
    %207 = vector.broadcast %206 : vector<16x1xf32> to vector<16x128xf32>
    %208 = arith.mulf %198, %207 : vector<16x128xf32>
    %209 = vector.broadcast %191 : vector<1x128xf32> to vector<16x128xf32>
    %210 = arith.mulf %208, %209 : vector<16x128xf32>
    %211 = vector.broadcast %192 : vector<1x128xf32> to vector<16x128xf32>
    %212 = arith.addf %210, %211 : vector<16x128xf32>
    %c0_83 = arith.constant 0 : index
    %c0_84 = arith.constant 0 : index
    %c0_85 = arith.constant 0 : index
    %213 = vector.load %arg18[%c0_83, %c0_84, %c0_85] : memref<1x16x128xf32, #tpu.memory_space<vmem>>, vector<1x16x128xf32>
    %214 = vector.shape_cast %213 : vector<1x16x128xf32> to vector<16x128xf32>
    %215 = vector.shape_cast %212 : vector<16x128xf32> to vector<1x16x128xf32>
    tpu.vector_store %arg18[%c0_83, %c0_84, %c0_85], %215 {strides = array<i32>} : memref<1x16x128xf32, #tpu.memory_space<vmem>>, vector<1x16x128xf32>,
    return
  }
  func.func @transform_0(%arg0: i32) -> (i32, i32, i32) {
    %c0_i32 = arith.constant 0 : i32
    %c0_i32_0 = arith.constant 0 : i32
    %c0_i32_1 = arith.constant 0 : i32
    return %arg0, %c0_i32, %c0_i32_0 : i32, i32, i32
  }
  func.func @transform_1(%arg0: i32) -> (i32, i32) {
    %c0_i32 = arith.constant 0 : i32
    %c0_i32_0 = arith.constant 0 : i32
    %c0_i32_1 = arith.constant 0 : i32
    return %c0_i32, %c0_i32_0 : i32, i32
  }
  func.func @transform_2(%arg0: i32) -> (i32, i32) {
    %c0_i32 = arith.constant 0 : i32
    %c0_i32_0 = arith.constant 0 : i32
    %c0_i32_1 = arith.constant 0 : i32
    return %c0_i32, %c0_i32_0 : i32, i32
  }
  func.func @transform_3(%arg0: i32) -> (i32, i32) {
    %c0_i32 = arith.constant 0 : i32
    %c0_i32_0 = arith.constant 0 : i32
    %c0_i32_1 = arith.constant 0 : i32
    return %c0_i32, %c0_i32_0 : i32, i32
  }
  func.func @transform_4(%arg0: i32) -> (i32, i32) {
    %c0_i32 = arith.constant 0 : i32
    %c0_i32_0 = arith.constant 0 : i32
    %c0_i32_1 = arith.constant 0 : i32
    return %c0_i32, %c0_i32_0 : i32, i32
  }
  func.func @transform_5(%arg0: i32) -> (i32, i32) {
    %c0_i32 = arith.constant 0 : i32
    %c0_i32_0 = arith.constant 0 : i32
    %c0_i32_1 = arith.constant 0 : i32
    return %c0_i32, %c0_i32_0 : i32, i32
  }
  func.func @transform_6(%arg0: i32) -> (i32, i32) {
    %c0_i32 = arith.constant 0 : i32
    %c0_i32_0 = arith.constant 0 : i32
    %c0_i32_1 = arith.constant 0 : i32
    return %c0_i32, %c0_i32_0 : i32, i32
  }
  func.func @transform_7(%arg0: i32) -> (i32, i32) {
    %c0_i32 = arith.constant 0 : i32
    %c0_i32_0 = arith.constant 0 : i32
    %c0_i32_1 = arith.constant 0 : i32
    return %c0_i32, %c0_i32_0 : i32, i32
  }
  func.func @transform_8(%arg0: i32) -> (i32, i32) {
    %c0_i32 = arith.constant 0 : i32
    %c0_i32_0 = arith.constant 0 : i32
    %c0_i32_1 = arith.constant 0 : i32
    return %c0_i32, %c0_i32_0 : i32, i32
  }
  func.func @transform_9(%arg0: i32) -> (i32, i32) {
    %c0_i32 = arith.constant 0 : i32
    %c0_i32_0 = arith.constant 0 : i32
    %c0_i32_1 = arith.constant 0 : i32
    return %c0_i32, %c0_i32_0 : i32, i32
  }
  func.func @transform_10(%arg0: i32) -> (i32, i32) {
    %c0_i32 = arith.constant 0 : i32
    %c0_i32_0 = arith.constant 0 : i32
    %c0_i32_1 = arith.constant 0 : i32
    return %c0_i32, %c0_i32_0 : i32, i32
  }
  func.func @transform_11(%arg0: i32) -> (i32, i32) {
    %c0_i32 = arith.constant 0 : i32
    %c0_i32_0 = arith.constant 0 : i32
    %c0_i32_1 = arith.constant 0 : i32
    return %c0_i32, %c0_i32_0 : i32, i32
  }
  func.func @transform_12(%arg0: i32) -> (i32, i32) {
    %c0_i32 = arith.constant 0 : i32
    %c0_i32_0 = arith.constant 0 : i32
    %c0_i32_1 = arith.constant 0 : i32
    return %c0_i32, %c0_i32_0 : i32, i32
  }
  func.func @transform_13(%arg0: i32) -> (i32, i32) {
    %c0_i32 = arith.constant 0 : i32
    %c0_i32_0 = arith.constant 0 : i32
    %c0_i32_1 = arith.constant 0 : i32
    return %c0_i32, %c0_i32_0 : i32, i32
  }
  func.func @transform_14(%arg0: i32) -> (i32, i32) {
    %c0_i32 = arith.constant 0 : i32
    %c0_i32_0 = arith.constant 0 : i32
    %c0_i32_1 = arith.constant 0 : i32
    return %c0_i32, %c0_i32_0 : i32, i32
  }
  func.func @transform_15(%arg0: i32) -> (i32, i32) {
    %c0_i32 = arith.constant 0 : i32
    %c0_i32_0 = arith.constant 0 : i32
    %c0_i32_1 = arith.constant 0 : i32
    return %c0_i32, %c0_i32_0 : i32, i32
  }
  func.func @transform_16(%arg0: i32) -> (i32, i32) {
    %c0_i32 = arith.constant 0 : i32
    %c0_i32_0 = arith.constant 0 : i32
    %c0_i32_1 = arith.constant 0 : i32
    return %c0_i32, %c0_i32_0 : i32, i32
  }
  func.func @transform_17(%arg0: i32) -> (i32, i32, i32) {
    %c0_i32 = arith.constant 0 : i32
    %c0_i32_0 = arith.constant 0 : i32
    %c0_i32_1 = arith.constant 0 : i32
    return %arg0, %c0_i32, %c0_i32_0 : i32, i32, i32
  }
}

</mosaic_0001>

<bundles_post_ra>
// kernel: hf_last_hidden_state.1
= control target key start
LH: loop header
LB: loop body
LE: loop exit
PB: predicated region body
PF: predicated region fallthrough
CT: control target
= control target key end

     0   :  { %s3628_s0 = inlined_call_operand.vmem [shape: s32[2,16,1], index: 0, kind: input, shape index: {}]   ;;  %s3629_s1 = inlined_call_operand.hbm [shape: bf16[128,128], index: 1, kind: input, shape index: {}]   ;;  %s3630_s2 = inlined_call_operand.vmem [shape: f32[16,128], index: 2, kind: input, shape index: {}]   ;;  %s3631_s3 = inlined_call_operand.vmem [shape: f32[1,128], index: 3, kind: input, shape index: {}]   ;;  %s3632_s4 = inlined_call_operand.vmem [shape: f32[1,128], index: 4, kind: input, shape index: {}]   ;;  %s3633_s5 = inlined_call_operand.hbm [shape: bf16[128,384], index: 5, kind: input, shape index: {}]   ;;  %s3634_s6 = inlined_call_operand.vmem [shape: f32[1,384], index: 6, kind: input, shape index: {}]   ;;  %s3635_s7 = inlined_call_operand.hbm [shape: bf16[128,128], index: 7, kind: input, shape index: {}]   ;;  %s3636_s8 = inlined_call_operand.vmem [shape: f32[1,128], index: 8, kind: input, shape index: {}]   ;;  %s3637_s9 = inlined_call_operand.vmem [shape: f32[1,128], index: 9, kind: input, shape index: {}]   ;;  %s3638_s10 = inlined_call_operand.vmem [shape: f32[1,128], index: 10, kind: input, shape index: {}]   ;;  %s3639_s11 = inlined_call_operand.hbm [shape: bf16[128,256], index: 11, kind: input, shape index: {}]   ;;  %s3640_s12 = inlined_call_operand.vmem [shape: f32[1,256], index: 12, kind: input, shape index: {}]   ;;  %s3641_s13 = inlined_call_operand.hbm [shape: bf16[256,128], index: 13, kind: input, shape index: {}]   ;;  %s3642_s14 = inlined_call_operand.vmem [shape: f32[1,128], index: 14, kind: input, shape index: {}]   ;;  %s3643_s15 = inlined_call_operand.vmem [shape: f32[1,128], index: 15, kind: input, shape index: {}]   ;;  %s3644_s16 = inlined_call_operand.vmem [shape: f32[1,128], index: 16, kind: input, shape index: {}]   ;;  %s3645_s17 = inlined_call_operand.hbm [shape: f32[2,16,128], index: 17, kind: output, shape index: {}]  }
   0x1   :  { %3657 = sst [smem:[#allocation23_spill]] %s3628_s0 }
   0x2   :  { %3658 = sst [smem:[#allocation24_spill]] %s3629_s1 }
   0x3   :  { %3659 = sst [smem:[#allocation25_spill]] %s3645_s17 }
   0x4   :  { %22 = vsyncpa [#allocation3], 0 }
   0x5   :  { %23 = vsyncpa [#allocation6], 0 }
   0x6   :  { %24 = vsyncpa [#allocation9], 0 }
   0x7   :  { %25 = vsyncpa [#allocation4], 0 }
   0x8   :  { %27 = vsyncpa [#allocation4 + $0x1], 0  ;;  %s3238_s24 = smov 0   ;;  %s3240_s25 = smov 0  }
   0x9   :  { %s3242_s26 = smov 0   ;;  %s3244_s27 = smov 0  }
   0xa LB: > { %3660 = sst [smem:[#allocation16_spill]] %s3113_s24  ;;  %s3259_s28 = sadd.s32 4294967295, %s3125_s27   ;;  %s3125_s27 = sphi %s3244_s27, %s3687_s27   ;;  %s3121_s26 = sphi %s3242_s26, %s3689_s26   ;;  %s3117_s25 = sphi %s3240_s25, %s3691_s25   ;;  %s3113_s24 = sphi %s3238_s24, %s3690_s24  }
   0xb   : > { %3661 = sst [smem:[#allocation17_spill]] %s3121_s26  ;;  %s2371_s29 = sadd.s32 4294967294, %s3125_s27  }
   0xc   : > { %3662 = sst [smem:[#allocation18_spill]] %s3125_s27  ;;  %s3263_s0 = sadd.s32 1, %s3125_s27  }
   0xd   : > { %3663 = sst [smem:[#allocation19_spill]] %s3263_s0  ;;  %s402_s30 = sadd.s32 1, %s3121_s26 }
   0xe   : > { %s399_s18 = ssub.s32 %s3125_s27, %s3263_s0  ;;  %p412_p0 = scmp.ne.s32.totalorder %s3121_s26, %s3117_s25 }
   0xf   : > { %p400_p1 = scmp.eq.s32.totalorder %s399_s18, 0  ;;  %p413_p2 = scmp.eq.s32.totalorder %s3259_s28, 1 }
  0x10   : > { %p418_p3 = scmp.ne.s32.totalorder %s3117_s25, %s3113_s24  ;;  %p419_p4 = scmp.eq.s32.totalorder %s2371_s29, 1 }
  0x11   : > { %s3274_s19 = scalar_select %p400_p1, %s3121_s26, %s402_s30  }
  0x12   : > { %p3276_p5 = por %p413_p2, %p412_p0  ;;  %p3280_p6 = por %p419_p4, %p418_p3 }
  0x13   : > { %3664 = sst [smem:[#allocation20_spill]] %s3274_s19  ;;  %p2372_p7 = scmp.ge.s32.totalorder %s3125_s27, 1 }
  0x14   : > { %s3665_s1 = scalar_select %p3276_p5, 1, 0 }
  0x15   : > { %s3667_s20 = scalar_select %p3280_p6, 1, 0 }
  0x16   : > { %3666 = sst [smem:[#allocation21_spill]] %s3665_s1  ;;  %p426_p8 = scmp.lt.s32.totalorder %s3125_s27, 3 }
  0x17   : > { %3668 = sst [smem:[#allocation22_spill]] %s3667_s20  ;;  %p3651_p9 = scmp.eq.s32.totalorder %s3259_s28, 0 }
  0x18   : > { %p3287_p10 = pnand %p2372_p7, %p426_p8  ;;  %s3127_s22 = smov [#allocation5]  }
  0x19   : > { %s460_s23 = sshll.u32 %s3127_s22, 4  ;;  %s3128_s30 = smov [#allocation8]   ;;  %s461_s23 = int_to_ptr.vmem [resolvable:$true] %s460_s23 }
  0x1a   : > { %p2699_p11 = pneg %p3287_p10  ;;  %s498_s18 = sshll.u32 %s3128_s30, 4  ;;  %s499_s18 = int_to_ptr.vmem [resolvable:$true] %s498_s18 }
  0x1b   : > { %s2934_s26 = scalar_lea.vmem %s461_s23, 3072  ;;  %p2942_p3 = scmp.lt.s32.totalorder %s461_s23, %s461_s23 }
  0x1c   : > { %p3295_p12 = pnand %p3651_p9, %p2699_p11  ;;  %p2935_p0 = scmp.ne.s32.totalorder %s461_s23, %s2934_s26 }
  0x1d   : > { %p2943_p4 = scmp.lt.s32.totalorder %s2934_s26, %s2934_s26 }
  0x1e   : > { %p3301_p13 = pneg %p3295_p12 }
  0x1f   : > { %p2944_p7 = por %p2943_p4, %p2942_p3 }
  0x20   : > { %p2937_p1 = pnand %p2935_p0, %p3301_p13 }
  0x22   : > { %p2938_p2 = pneg %p2937_p1 }
  0x24   : > { %p2945_p8 = pnand %p2944_p7, %p2938_p2 }
  0x26   : > { %2948 = shalt.err (!%p2945_p8)
}
  0x27   : > { %s3129_s22 = smov 192   ;;  %s3130_s30 = smov 12  }
  0x28   : > { %2705 = dma.hbm_to_vmem [thread:$0]  (!%p3295_p12), %s3633_s5, 3072, %s461_s23, [#allocation6], %s3129_s22, %s3129_s22, %s3130_s30  }
  0x29   : > { %s2960_s24 = scalar_lea.vmem %s499_s18, 2048  ;;  %p2968_p1 = scmp.lt.s32.totalorder %s499_s18, %s499_s18 }
  0x2a   : > { %p2961_p11 = scmp.ne.s32.totalorder %s499_s18, %s2960_s24  ;;  %p2969_p6 = scmp.lt.s32.totalorder %s2960_s24, %s2960_s24 }
  0x2c   : > { %p2963_p9 = pnand %p2961_p11, %p3301_p13  ;;  %p2970_p5 = por %p2969_p6, %p2968_p1 }
  0x2e   : > { %p2964_p0 = pneg %p2963_p9 }
  0x30   : > { %p2971_p3 = pnand %p2970_p5, %p2964_p0 }
  0x32   : > { %2974 = shalt.err (!%p2971_p3)
}
  0x33   : > { %s3131_s26 = smov 128   ;;  %s3132_s27 = smov 8  }
  0x34   : > { %2711 = dma.hbm_to_vmem [thread:$0]  (!%p3295_p12), %s3639_s11, 2048, %s499_s18, [#allocation9], %s3131_s26, %s3131_s26, %s3132_s27  }
  0x35   : > { %s3133_s0 = smov [#allocation2]  }
  0x36   : > { %s438_s20 = sshll.u32 %s3133_s0, 4  ;;  %s439_s20 = int_to_ptr.vmem [resolvable:$true] %s438_s20 }
  0x37   : > { %s2986_s23 = scalar_lea.vmem %s439_s20, 1024  ;;  %p2994_p6 = scmp.lt.s32.totalorder %s439_s20, %s439_s20 }
  0x38   : > { %p2987_p2 = scmp.ne.s32.totalorder %s439_s20, %s2986_s23  ;;  %p2995_p5 = scmp.lt.s32.totalorder %s2986_s23, %s2986_s23 }
  0x3a   : > { %p2989_p9 = pnand %p2987_p2, %p3301_p13  ;;  %p2996_p7 = por %p2995_p5, %p2994_p6 }
  0x3c   : > { %p2990_p4 = pneg %p2989_p9 }
  0x3e   : > { %p2997_p8 = pnand %p2996_p7, %p2990_p4 }
  0x40   : > { %3000 = shalt.err (!%p2997_p8)
}
  0x41   : > { %s3134_s24 = smov 64   ;;  %s3135_s22 = smov 4  }
  0x42   : > { %s3672_s1 = sld [smem:[#allocation24_spill]]  ;;  %s3136_s18 = smov [#allocation7]  }
  0x43   : > { %s476_s30 = sshll.u32 %s3136_s18, 4  ;;  %s3137_s26 = smov [#allocation10]   ;;  %s477_s30 = int_to_ptr.vmem [resolvable:$true] %s476_s30 }
  0x44   : > { %s514_s0 = sshll.u32 %s3137_s26, 4  ;;  %s3012_s23 = scalar_lea.vmem %s477_s30, 1024  ;;  %s515_s0 = int_to_ptr.vmem [resolvable:$true] %s514_s0 }
  0x45   : > { %p3013_p11 = scmp.ne.s32.totalorder %s477_s30, %s3012_s23  ;;  %p3020_p3 = scmp.lt.s32.totalorder %s477_s30, %s477_s30 }
  0x46   : > { %p3021_p2 = scmp.lt.s32.totalorder %s3012_s23, %s3012_s23 }
  0x47   : > { %p3015_p0 = pnand %p3013_p11, %p3301_p13 }
  0x48   : > { %2702 = dma.hbm_to_vmem [thread:$0]  (!%p3295_p12), %s3672_s1, 1024, %s439_s20, [#allocation3], %s3134_s24, %s3134_s24, %s3135_s22  }
  0x49   : > { %p3016_p1 = pneg %p3015_p0  ;;  %p3022_p9 = por %p3021_p2, %p3020_p3 }
  0x4b   : > { %p3023_p4 = pnand %p3022_p9, %p3016_p1 }
  0x4d   : > { %3026 = shalt.err (!%p3023_p4)
}
  0x4e   : > { %2708 = dma.hbm_to_vmem [thread:$0]  (!%p3295_p12), %s3635_s7, 1024, %s477_s30, [#allocation6], %s3134_s24, %s3134_s24, %s3135_s22  }
  0x4f   : > { %s3038_s27 = scalar_lea.vmem %s515_s0, 2048  ;;  %p3046_p8 = scmp.lt.s32.totalorder %s515_s0, %s515_s0 }
  0x50   : > { %p3039_p6 = scmp.ne.s32.totalorder %s515_s0, %s3038_s27  ;;  %p3047_p11 = scmp.lt.s32.totalorder %s3038_s27, %s3038_s27 }
  0x52   : > { %p3041_p5 = pnand %p3039_p6, %p3301_p13  ;;  %p3048_p0 = por %p3047_p11, %p3046_p8 }
  0x54   : > { %p3042_p7 = pneg %p3041_p5 }
  0x56   : > { %p3049_p1 = pnand %p3048_p0, %p3042_p7 }
  0x58   : > { %3052 = shalt.err (!%p3049_p1)
}
  0x59   : > { %2714 = dma.hbm_to_vmem [thread:$0]  (!%p3295_p12), %s3641_s13, 2048, %s515_s0, [#allocation9], %s3134_s24, %s3134_s24, %s3135_s22  }
  0x5a   : > { %547 = sbr.rel (%p3287_p10) target bundleno = 4693 (0x1255), region = 88  ;;  %p3673_p13 = scmp.eq.s32.totalorder (!%p3287_p10), %s3259_s28, 0 }
  0x5f   : > { %3096 = dma.done.wait (%p3673_p13), [#allocation3], 1024   ;;  %p3674_p3 = pmov %p3673_p13 }
  0x61   : > { %3098 = vsyncadd (%p3674_p3), [#allocation3], 4294966272  ;;  %p3675_p2 = pmov %p3674_p3 }
  0x63   : > { %3100 = dma.done.wait (%p3675_p2), [#allocation6], 4096   ;;  %p3676_p9 = pmov %p3675_p2 }
  0x64   : > { %p3677_p4 = pmov %p3675_p2 }
  0x65   : > { %3102 = vsyncadd (%p3676_p9), [#allocation6], 4294963200 }
  0x66   : > { %3104 = dma.done.wait (%p3677_p4), [#allocation9], 4096   ;;  %p3678_p12 = pmov %p3675_p2 }
  0x67   : > { %p615_p10 = scmp.lt.s32.totalorder %s3259_s28, 1  ;;  %v3138_v0 = vmov 0   ;;  %v3139_v1 = vmov 0.0   ;;  %s3679_s22 = sld [smem:[#allocation23_spill]]  ;;  %v2783_v3 = vld [vmem:[#allocation2 + $0x38] sm:$0xff]   ;;  %vm3140_vm0 = vmmov 0   ;;  %v623_v12 = vlaneseq }
  0x68   : > { %3106 = vsyncadd (%p3678_p12), [#allocation9], 4294963200  ;;  %2782 = vset.pattern.permute.xlu0 %v3138_v0  ;;  %2557 = vmatprep.subr.bf16.mxu0 %v3139_v1  ;;  %v2784_v5 = vld [vmem:[#allocation2 + $0x30] sm:$0xff]   ;;  %v2785_v6 = vld [vmem:[#allocation2 + $0x28] sm:$0xff]   ;;  %v3141_v16 = vmov 1.0|1.0  }
  0x69   : > { %s616_s19 = scalar_select %p615_p10, %s3259_s28, 1  ;;  %994 = vmatprep.mubr.bf16.mxu1 %v3138_v0  ;;  %2573 = vmatprep.mubr.msk.bf16.mxu0 %vm3140_vm0, %v3139_v1  ;;  %v2786_v7 = vld [vmem:[#allocation2 + $0x20] sm:$0xff]   ;;  %v2787_v8 = vld [vmem:[#allocation2 + $0x18] sm:$0xff]   ;;  %v2788_v9 = vld [vmem:[#allocation2 + $0x10] sm:$0xff]   ;;  %v624_v14 = vand.u32 127, %v623_v12  ;;  %vm1059_vm4 = vcmask 261120  }
  0x6a   : > { %2558 = vmatpush3.bf16.msra.mxu0 %v2783_v3  ;;  %v2789_v10 = vld [vmem:[#allocation2 + $0x8] sm:$0xff]   ;;  %v2790_v11 = vld [vmem:[#allocation2] sm:$0xff]   ;;  %v2794_v27 = vld [vmem:[#allocation5 + $0xb0] ss:$12 sps:$4 sm:$0xff]   ;;  %s3142_s29 = smov 96   ;;  %vm1107_vm5 = vcmask 130048  }
  0x6b   : > { %s2487_s21 = sshll.u32 %s616_s19, 4  ;;  %2559 = vmatprep.subr.bf16.mxu0 %v3139_v1  ;;  %v652_v17 = vld [vmem:[%s3630_s2] sm:$0xff]  ;;  %v653_v21 = vld [vmem:[%s3630_s2 + $0x8] sm:$0xff]  ;;  %v2797_v37 = vld [vmem:[#allocation5 + $0x90] ss:$12 sps:$4 sm:$0xff]   ;;  %s3143_s24 = smov 64  }
  0x6c   : > { %v2791_v25 = vld [vmem:[#allocation5 + $0xac] ss:$12 sps:$4 sm:$0xff]   ;;  %v2793_v26 = vld [vmem:[#allocation5 + $0xa8] ss:$12 sps:$4 sm:$0xff]   ;;  %v2803_v42 = vld [vmem:[#allocation5 + $0x64] ss:$12 sps:$4 sm:$0xff]  }
  0x6d   : > { %s619_s30 = scalar_lea.vmem %s3679_s22, %s2487_s21  ;;  %962 = vmatprep.subr.bf16.mxu1 %v2791_v25  ;;  %v2795_v36 = vld [vmem:[#allocation5 + $0x94] ss:$12 sps:$4 sm:$0xff]   ;;  %v2798_v38 = vld [vmem:[#allocation5 + $0x98] ss:$12 sps:$4 sm:$0xff]   ;;  %v2799_v39 = vld [vmem:[#allocation5 + $0x7c] ss:$12 sps:$4 sm:$0xff]  }
  0x6e   : > { %v621_v2 = vld [vmem:[%s619_s30] sm:$0xff]  ;;  %v622_v4 = vld [vmem:[%s619_s30 + $0x8] sm:$0xff]  ;;  %2560 = vmatpush3.bf16.msra.mxu0 %v2784_v5  ;;  %963 = vmatpush1.bf16.msra.mxu1 %v2793_v26  ;;  %v2810_v47 = vld [vmem:[#allocation5 + $0x50] ss:$12 sps:$4 sm:$0xff]   ;;  %s3144_s22 = smov 32   ;;  %s612_s21 = sand.u32 1, %s3117_s25  }
  0x6f   : > { %626 = vperm.xlu0 %2782, %v621_v2   ;;  %2561 = vmatprep.subr.bf16.mxu0 %v3139_v1  ;;  %v2801_v40 = vld [vmem:[#allocation5 + $0x78] ss:$12 sps:$4 sm:$0xff]   ;;  %v2802_v41 = vld [vmem:[#allocation5 + $0x80] ss:$12 sps:$4 sm:$0xff]   ;;  %v2806_v44 = vld [vmem:[#allocation5 + $0x68] ss:$12 sps:$4 sm:$0xff]  }
  0x70   : > { %964 = vmatprep.subr.bf16.mxu1 %v2795_v36  ;;  %v2805_v43 = vld [vmem:[#allocation5 + $0x60] ss:$12 sps:$4 sm:$0xff]   ;;  %v2809_v46 = vld [vmem:[#allocation5 + $0x48] ss:$12 sps:$4 sm:$0xff]   ;;  %v2813_v49 = vld [vmem:[#allocation5 + $0x30] ss:$12 sps:$4 sm:$0xff]  }
  0x71   : > { %v2807_v45 = vld [vmem:[#allocation5 + $0x4c] ss:$12 sps:$4 sm:$0xff]   ;;  %v2811_v48 = vld [vmem:[#allocation5 + $0x34] ss:$12 sps:$4 sm:$0xff]   ;;  %v2815_v51 = vld [vmem:[#allocation5 + $0x1c] ss:$12 sps:$4 sm:$0xff]  }
  0x72   : > { %2562 = vmatpush3.bf16.msra.mxu0 %v2785_v6  ;;  %965 = vmatpush1.bf16.msra.mxu1 %v2797_v37  ;;  %v2814_v50 = vld [vmem:[#allocation5 + $0x38] ss:$12 sps:$4 sm:$0xff]   ;;  %v2818_v53 = vld [vmem:[#allocation5 + $0x20] ss:$12 sps:$4 sm:$0xff]   ;;  %v2822_v56 = vld [vmem:[#allocation5 + $0x8] ss:$12 sps:$4 sm:$0xff]  }
  0x73   : > { %629 = vperm.xlu0 %2782, %v622_v4   ;;  %2563 = vmatprep.subr.bf16.mxu0 %v3139_v1  ;;  %v2817_v52 = vld [vmem:[#allocation5 + $0x18] ss:$12 sps:$4 sm:$0xff]   ;;  %v2821_v55 = vld [vmem:[#allocation5] ss:$12 sps:$4 sm:$0xff]   ;;  %s3680_s0 = sld [smem:[#allocation21_spill]]  ;;  %s2488_s23 = sshll.u32 %s3259_s28, 8 }
  0x74   : > { %966 = vmatprep.subr.bf16.mxu1 %v2799_v39  ;;  %v2819_v54 = vld [vmem:[#allocation5 + $0x4] ss:$12 sps:$4 sm:$0xff]   ;;  %v2398_v3 = vld [vmem:[%s3631_s3] ss:$0 sm:$0xff]  ;;  %s3681_s18 = sld [smem:[#allocation25_spill]]  ;;  %s3145_s28 = smov [#allocation11]  }
  0x76   : > { %2564 = vmatpush3.bf16.msra.mxu0 %v2786_v7  ;;  %967 = vmatpush1.bf16.msra.mxu1 %v2801_v40  ;;  %v2399_v7 = vld [vmem:[%s3632_s4] ss:$0 sm:$0xff] }
  0x77   : > { %2565 = vmatprep.subr.bf16.mxu0 %v3139_v1  ;;  %968 = vmatprep.subr.bf16.mxu1 %v2803_v42 }
  0x79   : > { %p3682_p5 = scmp.ne.s32.totalorder %s3680_s0, 0 }
  0x7a   : > { %2566 = vmatpush3.bf16.msra.mxu0 %v2787_v8  ;;  %969 = vmatpush1.bf16.msra.mxu1 %v2805_v43  ;;  %s3584_s19 = scalar_lea.hbm %s3681_s18, %s2488_s23 }
  0x7b   : > { %2567 = vmatprep.subr.bf16.mxu0 %v3139_v1  ;;  %970 = vmatprep.subr.bf16.mxu1 %v2807_v45 }
  0x7e   : > { %2568 = vmatpush3.bf16.msra.mxu0 %v2788_v9  ;;  %971 = vmatpush1.bf16.msra.mxu1 %v2809_v46 }
  0x7f   : > { %2569 = vmatprep.subr.bf16.mxu0 %v3139_v1  ;;  %972 = vmatprep.subr.bf16.mxu1 %v2811_v48 }
  0x82   : > { %2570 = vmatpush3.bf16.msra.mxu0 %v2789_v10  ;;  %973 = vmatpush1.bf16.msra.mxu1 %v2813_v49 }
  0x83   : > { %2571 = vmatprep.subr.bf16.mxu0 %v3139_v1  ;;  %974 = vmatprep.subr.bf16.mxu1 %v2815_v51 }
  0x86   : > { %2572 = vmatpush3.bf16.msra.mxu0 %v2790_v11  ;;  %975 = vmatpush1.bf16.msra.mxu1 %v2817_v52 }
  0x87   : > { %2577 = vmatprep.subr.bf16.mxu0 %v3139_v1  ;;  %976 = vmatprep.subr.bf16.mxu1 %v2819_v54 }
  0x8a   : > { %977 = vmatpush1.bf16.msra.mxu1 %v2821_v55 }
  0x8b   : > { %2597 = vmatprep.subr.bf16.mxu1 %v3139_v1 }
  0xea   : > { %v627_v13 = vpop.permute.xlu0 %626 }
  0xeb   : > { %vm631_vm1 = vcmp.eq.s32.totalorder %v624_v14, %v627_v13  ;;  %v3426_v13 = vshrl.u32 %v623_v12, 7 }
  0xee   : > { %v630_v15 = vpop.permute.xlu0 %629 }
  0xef   : > { %vm632_vm2 = vcmp.eq.s32.totalorder %v624_v14, %v630_v15  ;;  %v821_v14 = vsub.s32 0, %v3426_v13  ;;  %v817_v15 = vld [vmem:[%s3634_s6] sm:$0x7] }
  0xf0   : > { %vm2396_vm3 = vmpackc.low %vm632_vm2, %vm631_vm1 }
  0xf1   : > { %2574 = vmatmul.mubr.msk.bf16.vlgmr.msra.gmra.mxu0 %vm2396_vm3, %v3141_v16  ;;  %v822_v16 = vrot.slane %v817_v15, %v821_v14 }
  0xf2   : > { %2593 = vmatprep.mubr.msk.bf16.mxu0 %vm3140_vm0, %v3139_v1  ;;  %2578 = vmatpush3.bf16.msra.mxu0 %v2794_v27 }
  0xf3   : > { %2579 = vmatprep.subr.bf16.mxu0 %v3139_v1 }
  0xf6   : > { %2580 = vmatpush3.bf16.msra.mxu0 %v2798_v38 }
  0xf7   : > { %2581 = vmatprep.subr.bf16.mxu0 %v3139_v1 }
  0xfa   : > { %2582 = vmatpush3.bf16.msra.mxu0 %v2802_v41 }
  0xfb   : > { %2583 = vmatprep.subr.bf16.mxu0 %v3139_v1 }
  0xfe   : > { %2584 = vmatpush3.bf16.msra.mxu0 %v2806_v44 }
  0xff   : > { %2585 = vmatprep.subr.bf16.mxu0 %v3139_v1 }
 0x102   : > { %2586 = vmatpush3.bf16.msra.mxu0 %v2810_v47 }
 0x103   : > { %2587 = vmatprep.subr.bf16.mxu0 %v3139_v1 }
 0x106   : > { %2588 = vmatpush3.bf16.msra.mxu0 %v2814_v50 }
 0x107   : > { %2589 = vmatprep.subr.bf16.mxu0 %v3139_v1 }
 0x10a   : > { %2590 = vmatpush3.bf16.msra.mxu0 %v2818_v53 }
 0x10b   : > { %2591 = vmatprep.subr.bf16.mxu0 %v3139_v1 }
 0x10e   : > { %2592 = vmatpush3.bf16.msra.mxu0 %v2822_v56 }
 0x10f   : > { %2623 = vmatprep.subr.bf16.mxu0 %v3139_v1 }
 0x1b1   : > { %v736_v18 = vpop.f32.mrf.mxu0 }
 0x1b2   : > { %v737_v19 = vadd.f32 %v736_v18, %v652_v17  ;;  %v825_v17 = vsub.s32 1, %v3426_v13 }
 0x1b3   : > { %v2575_v20 = vpop.f32.mrf.mxu0 }
 0x1b4   : > { %745 = vadd.xlane.f32.xlu1 %v737_v19  ;;  %v826_v12 = vrot.slane %v817_v15, %v825_v17 }
 0x1b5   : > { %v739_v22 = vpop.f32.mrf.mxu0 }
 0x1b6   : > { %v740_v23 = vadd.f32 %v739_v22, %v653_v21 }
 0x1b7   : > { %v2576_v24 = vpop.f32.mrf.mxu0 }
 0x1b8   : > { %747 = vadd.xlane.f32.xlu1 %v740_v23 }
 0x23d   : > { %v746_v28 = vpop.xlane.xlu1 %745 }
 0x23e   : > { %v750_v29 = vmul.f32 0.0078125, %v746_v28 }
 0x240   : > { %v3391_v30 = vsub.f32 %v737_v19, %v750_v29 }
 0x241   : > { %v748_v31 = vpop.xlane.xlu1 %747 }
 0x242   : > { %v751_v32 = vmul.f32 0.0078125, %v748_v31  ;;  %v754_v33 = vmul.f32 %v3391_v30, %v3391_v30 }
 0x244   : > { %v3395_v34 = vsub.f32 %v740_v23, %v751_v32  ;;  %756 = vadd.xlane.f32.xlu0 %v754_v33  ;;  %v829_v32 = vsub.s32 2, %v3426_v13 }
 0x246   : > { %v755_v35 = vmul.f32 %v3395_v34, %v3395_v34  ;;  %v830_v36 = vrot.slane %v817_v15, %v829_v32 }
 0x248   : > { %758 = vadd.xlane.f32.xlu1 %v755_v35 }
 0x2cd   : > { %v757_v57 = vpop.xlane.xlu0 %756 }
 0x2ce   : > { %v760_v58 = vmul.f32 0.0078125, %v757_v57 }
 0x2d0   : > { %v762_v59 = vadd.f32 1e-05, %v760_v58 }
 0x2d1   : > { %v759_v60 = vpop.xlane.xlu1 %758 }
 0x2d2   : > { %2871 = vrsqrt.f32 %v762_v59  ;;  %v761_v61 = vmul.f32 0.0078125, %v759_v60 }
 0x2d4   : > { %v763_v62 = vadd.f32 1e-05, %v761_v61 }
 0x2d6   : > { %2873 = vrsqrt.f32 %v763_v62  ;;  %v2823_v62 = vld [vmem:[#allocation7 + $0x8] sm:$0xff]  }
 0x2df   : > { %v2872_v63 = vpop.eup %2871 }
 0x2e0   : > { %v766_v2 = vmul.f32 %v2872_v63, %v3391_v30 }
 0x2e2   : > { %v774_v6 = vmul.f32 %v2398_v3, %v766_v2  ;;  %v2824_v2 = vld [vmem:[#allocation7] sm:$0xff]  }
 0x2e3   : > { %v2874_v4 = vpop.eup %2873 }
 0x2e4   : > { %v767_v5 = vmul.f32 %v2874_v4, %v3395_v34  ;;  %v3415_v9 = vadd.f32 %v2399_v7, %v774_v6 }
 0x2e6   : > { %v775_v8 = vmul.f32 %v2398_v3, %v767_v5 }
 0x2e8   : > { %v3417_v10 = vadd.f32 %v2399_v7, %v775_v8 }
 0x2ea   : > { %v784_v11 = vpack.c.bf16 %v3417_v10, %v3415_v9 }
 0x2ec   : > { %995 = vmatmul.mubr.bf16.vlgmr.msra.gmra.mxu1 %v784_v11  ;;  %2594 = vmatmul.mubr.bf16.vlgmr.msra.gmra.mxu0 %v784_v11 }
 0x2ed   : > { %2599 = vmatprep.mubr.msk.bf16.mxu1 %vm3140_vm0, %v3139_v1  ;;  %2625 = vmatprep.mubr.msk.bf16.mxu0 %vm3140_vm0, %v3139_v1 }
 0x3ac   : > { %v996_v18 = vpop.f32.mrf.mxu1  ;;  %v1039_v19 = vpop.f32.mrf.mxu0 }
 0x3ad   : > { %v997_v22 = vadd.f32 %v996_v18, %v822_v16  ;;  %v1040_v38 = vadd.f32 %v1039_v19, %v830_v36 }
 0x3ae   : > { %v998_v20 = vpop.f32.mrf.mxu1  ;;  %v2595_v21 = vpop.f32.mrf.mxu0 }
 0x3af   : > { %v1046_v28 = vmul.f32 0.17677669, %v997_v22  ;;  %v999_v29 = vadd.f32 %v998_v20, %v826_v12 }
 0x3b0   : > { %v1000_v23 = vpop.f32.mrf.mxu1  ;;  %v1042_v24 = vpop.f32.mrf.mxu0 }
 0x3b1   : > { %v1001_v25 = vadd.f32 %v1000_v23, %v822_v16  ;;  %v1043_v37 = vadd.f32 %v1042_v24, %v830_v36 }
 0x3b2   : > { %v1002_v26 = vpop.f32.mrf.mxu1  ;;  %v2596_v27 = vpop.f32.mrf.mxu0 }
 0x3b3   : > { %v1047_v30 = vmul.f32 0.17677669, %v1001_v25  ;;  %v1003_v31 = vadd.f32 %v1002_v26, %v826_v12  ;;  %v3447_v39 = vpack.c.bf16 %v1043_v37, %v1040_v38 }
 0x3b5   : > { %v3438_v33 = vpack.c.bf16 %v1047_v30, %v1046_v28  ;;  %v3440_v34 = vpack.c.bf16 %v1003_v31, %v999_v29 }
 0x3b7   : > { %1239 = vrot.lane.b32.xlu0 %v3438_v33, %s3142_s29  ;;  %v1064_v35 = vsel %vm1059_vm4, %v3440_v34, 0 }
 0x3b8   : > { %2598 = vmatpush3.bf16.xpose.msra.mxu1 %v1064_v35 }
 0x3b9   : > { %2603 = vmatprep.subr.bf16.mxu1 %v3139_v1 }
 0x3bf   : > { %2600 = vmatmul.mubr.msk.bf16.vlgmr.msra.gmra.mxu1 %vm1059_vm4, %v3438_v33 }
 0x3c0   : > { %2604 = vmatpush3.bf16.msra.mxu1 %v3447_v39  ;;  %2605 = vmatprep.mubr.msk.bf16.mxu1 %vm3140_vm0, %v3139_v1 }
 0x3c1   : > { %2609 = vmatprep.subr.bf16.mxu1 %v3139_v1 }
 0x429   : > { %v1240_v15 = vpop.permute.xlu0 %1239 }
 0x47f   : > { %v1100_v40 = vpop.f32.mrf.mxu1 }
 0x480   : > { %v1108_v41 = vsel %vm1107_vm5, %v1100_v40, -inf }
 0x481   : > { %1109 = vmax.xlane.f32.xlu1 %v1108_v41  ;;  %v2601_v42 = vpop.f32.mrf.mxu1 }
 0x483   : > { %v1103_v43 = vpop.f32.mrf.mxu1 }
 0x484   : > { %v1111_v44 = vsel %vm1107_vm5, %v1103_v43, -inf }
 0x485   : > { %1112 = vmax.xlane.f32.xlu1 %v1111_v44  ;;  %v2602_v45 = vpop.f32.mrf.mxu1 }
 0x50a   : > { %v1110_v46 = vpop.xlane.xlu1 %1109 }
 0x50b   : > { %v1114_v47 = vsub.f32 %v1100_v40, %v1110_v46 }
 0x50d   : > { %v1116_v48 = vmul.f32 1.442695, %v1114_v47 }
 0x50e   : > { %v1113_v49 = vpop.xlane.xlu1 %1112 }
 0x50f   : > { %2875 = vpow2.f32 %v1116_v48  ;;  %v1115_v50 = vsub.f32 %v1103_v43, %v1113_v49 }
 0x511   : > { %v1118_v51 = vmul.f32 1.442695, %v1115_v50  ;;  %v2825_v50 = vld [vmem:[#allocation7 + $0x18] sm:$0xff]  }
 0x513   : > { %2877 = vpow2.f32 %v1118_v51  ;;  %v2826_v51 = vld [vmem:[#allocation7 + $0x10] sm:$0xff]  }
 0x51c   : > { %v2876_v52 = vpop.eup %2875 }
 0x51d   : > { %v1120_v53 = vsel %vm1107_vm5, %v2876_v52, 0.0 }
 0x51e   : > { %1121 = vadd.xlane.f32.xlu1 %v1120_v53 }
 0x520   : > { %v2878_v54 = vpop.eup %2877 }
 0x521   : > { %v1123_v55 = vsel %vm1107_vm5, %v2878_v54, 0.0 }
 0x522   : > { %1124 = vadd.xlane.f32.xlu1 %v1123_v55 }
 0x533   : > { %1242 = vrot.lane.b32.xlu1 %v3440_v34, %s3142_s29 }
 0x5a7   : > { %v1122_v56 = vpop.xlane.xlu1 %1121 }
 0x5a8   : > { %2879 = vrcp.f32 %v1122_v56 }
 0x5ab   : > { %v1125_v57 = vpop.xlane.xlu1 %1124 }
 0x5ac   : > { %2881 = vrcp.f32 %v1125_v57 }
 0x5af   : > { %v1243_v5 = vpop.permute.xlu1 %1242 }
 0x5b0   : > { %v1248_v11 = vsel %vm1059_vm4, %v1243_v5, 0 }
 0x5b5   : > { %v2880_v58 = vpop.eup %2879 }
 0x5b6   : > { %v1128_v60 = vmul.f32 %v2880_v58, %v2876_v52 }
 0x5b9   : > { %v2882_v59 = vpop.eup %2881 }
 0x5ba   : > { %v1129_v61 = vmul.f32 %v2882_v59, %v2878_v54 }
 0x5bc   : > { %v1130_v63 = vpack.c.bf16 %v1129_v61, %v1128_v60 }
 0x5be   : > { %2606 = vmatmul.mubr.msk.bf16.vlgmr.msra.gmra.mxu1 %vm1107_vm5, %v1130_v63 }
 0x5bf   : > { %2610 = vmatpush3.bf16.msra.mxu1 %v2823_v62  ;;  %2613 = vmatprep.mubr.msk.bf16.mxu1 %vm3140_vm0, %v3139_v1 }
 0x5c0   : > { %2611 = vmatprep.subr.bf16.mxu1 %v3139_v1 }
 0x5c3   : > { %2612 = vmatpush3.bf16.msra.mxu1 %v2824_v2 }
 0x5c4   : > { %2617 = vmatprep.subr.bf16.mxu1 %v3139_v1 }
 0x67e   : > { %v1168_v3 = vpop.f32.mrf.mxu1 }
 0x680   : > { %v2607_v4 = vpop.f32.mrf.mxu1 }
 0x682   : > { %v1171_v6 = vpop.f32.mrf.mxu1 }
 0x683   : > { %v1175_v7 = vpack.c.bf16 %v1171_v6, %v1168_v3 }
 0x684   : > { %v2608_v8 = vpop.f32.mrf.mxu1 }
 0x685   : > { %2614 = vmatmul.mubr.msk.bf16.vlgmr.msra.gmra.mxu1 %vm1059_vm4, %v1175_v7 }
 0x686   : > { %2618 = vmatpush3.bf16.xpose.msra.mxu1 %v1248_v11  ;;  %2619 = vmatprep.mubr.msk.bf16.mxu1 %vm3140_vm0, %v3139_v1 }
 0x687   : > { %2629 = vmatprep.subr.bf16.mxu1 %v3139_v1 }
 0x68d   : > { %2620 = vmatmul.mubr.msk.bf16.vlgmr.msra.gmra.mxu1 %vm1059_vm4, %v1240_v15 }
 0x68e   : > { %2633 = vmatprep.mubr.msk.bf16.mxu1 %vm3140_vm0, %v3139_v1  ;;  %2630 = vmatpush3.bf16.msra.mxu1 %v2825_v50 }
 0x68f   : > { %2631 = vmatprep.subr.bf16.mxu1 %v3139_v1 }
 0x692   : > { %2632 = vmatpush3.bf16.msra.mxu1 %v2826_v51 }
 0x693   : > { %2643 = vmatprep.subr.bf16.mxu1 %v3139_v1 }
 0x745   : > { %v3474_v16 = vpop.f32.mrf.mxu1 }
 0x747   : > { %v2615_v18 = vpop.f32.mrf.mxu1 }
 0x748   : > { %v2424_v18 = vld [vmem:[%s3636_s8] ss:$0 sm:$0xff] }
 0x749   : > { %v3476_v19 = vpop.f32.mrf.mxu1 }
 0x74b   : > { %v2616_v20 = vpop.f32.mrf.mxu1 }
 0x74c   : > { %v1236_v20 = vadd.f32 %v2424_v18, %v3474_v16 }
 0x74d   : > { %v1284_v21 = vpop.f32.mrf.mxu1 }
 0x74e   : > { %v1291_v22 = vsel %vm1107_vm5, %v1284_v21, -inf }
 0x74f   : > { %1292 = vmax.xlane.f32.xlu1 %v1291_v22  ;;  %v2621_v12 = vpop.f32.mrf.mxu1 }
 0x751   : > { %v1287_v23 = vpop.f32.mrf.mxu1 }
 0x752   : > { %v1294_v24 = vsel %vm1107_vm5, %v1287_v23, -inf }
 0x753   : > { %1295 = vmax.xlane.f32.xlu0 %v1294_v24  ;;  %v2622_v25 = vpop.f32.mrf.mxu1 }
 0x769   : > { %1427 = vrot.lane.b32.xlu0 %v3440_v34, %s3143_s24 }
 0x7d8   : > { %v1293_v26 = vpop.xlane.xlu1 %1292 }
 0x7d9   : > { %v1297_v27 = vsub.f32 %v1284_v21, %v1293_v26 }
 0x7db   : > { %v1299_v28 = vmul.f32 1.442695, %v1297_v27 }
 0x7dc   : > { %v1296_v29 = vpop.xlane.xlu0 %1295 }
 0x7dd   : > { %2883 = vpow2.f32 %v1299_v28  ;;  %v1298_v30 = vsub.f32 %v1287_v23, %v1296_v29  ;;  %v1237_v23 = vadd.f32 %v2424_v18, %v3476_v19  ;;  %v2829_v18 = vld [vmem:[#allocation7 + $0x38] sm:$0xff]  }
 0x7df   : > { %v1301_v31 = vmul.f32 1.442695, %v1298_v30 }
 0x7e0   : > { %v1428_v46 = vpop.permute.xlu0 %1427 }
 0x7e1   : > { %2885 = vpow2.f32 %v1301_v31  ;;  %v1433_v48 = vsel %vm1059_vm4, %v1428_v46, 0 }
 0x7ea   : > { %v2884_v32 = vpop.eup %2883 }
 0x7eb   : > { %v1303_v35 = vsel %vm1107_vm5, %v2884_v32, 0.0 }
 0x7ec   : > { %1304 = vadd.xlane.f32.xlu1 %v1303_v35 }
 0x7ee   : > { %v2886_v36 = vpop.eup %2885 }
 0x7ef   : > { %v1306_v37 = vsel %vm1107_vm5, %v2886_v36, 0.0 }
 0x7f0   : > { %1307 = vadd.xlane.f32.xlu1 %v1306_v37  ;;  %v2828_v37 = vld [vmem:[#allocation7 + $0x20] sm:$0xff]  }
 0x801   : > { %1315 = vrot.lane.b32.xlu1 %v3447_v39, %s3142_s29  ;;  %s3588_s29 = scalar_lea.sflag [#allocation4], %s612_s21 }
 0x805   : > { %1425 = vrot.lane.b32.xlu1 %v3438_v33, %s3143_s24 }
 0x875   : > { %v1305_v38 = vpop.xlane.xlu1 %1304 }
 0x876   : > { %2887 = vrcp.f32 %v1305_v38 }
 0x879   : > { %v1308_v40 = vpop.xlane.xlu1 %1307 }
 0x87a   : > { %2889 = vrcp.f32 %v1308_v40 }
 0x87d   : > { %v1316_v41 = vpop.permute.xlu1 %1315 }
 0x87e   : > { %2624 = vmatpush3.bf16.msra.mxu0 %v1316_v41 }
 0x87f   : > { %2637 = vmatprep.subr.bf16.mxu0 %v3139_v1 }
 0x881   : > { %v1426_v49 = vpop.permute.xlu1 %1425 }
 0x883   : > { %v2888_v42 = vpop.eup %2887 }
 0x884   : > { %v1311_v44 = vmul.f32 %v2888_v42, %v2884_v32 }
 0x887   : > { %v2890_v43 = vpop.eup %2889 }
 0x888   : > { %v1312_v45 = vmul.f32 %v2890_v43, %v2886_v36  ;;  %v2827_v36 = vld [vmem:[#allocation7 + $0x28] sm:$0xff]  }
 0x88a   : > { %v1313_v47 = vpack.c.bf16 %v1312_v45, %v1311_v44 }
 0x88c   : > { %2626 = vmatmul.mubr.msk.bf16.vlgmr.msra.gmra.mxu0 %vm1107_vm5, %v1313_v47 }
 0x88d   : > { %2638 = vmatpush3.bf16.xpose.msra.mxu0 %v1433_v48  ;;  %2639 = vmatprep.mubr.msk.bf16.mxu0 %vm3140_vm0, %v3139_v1 }
 0x88e   : > { %2649 = vmatprep.subr.bf16.mxu0 %v3139_v1 }
 0x894   : > { %2640 = vmatmul.mubr.msk.bf16.vlgmr.msra.gmra.mxu0 %vm1059_vm4, %v1426_v49 }
 0x895   : > { %2653 = vmatprep.mubr.msk.bf16.mxu0 %vm3140_vm0, %v3139_v1  ;;  %2650 = vmatpush3.bf16.msra.mxu0 %v2827_v36 }
 0x896   : > { %2651 = vmatprep.subr.bf16.mxu0 %v3139_v1 }
 0x899   : > { %2652 = vmatpush3.bf16.msra.mxu0 %v2828_v37 }
 0x89a   : > { %2663 = vmatprep.subr.bf16.mxu0 %v3139_v1 }
 0x94c   : > { %v1355_v52 = vpop.f32.mrf.mxu0 }
 0x94e   : > { %v2627_v53 = vpop.f32.mrf.mxu0 }
 0x950   : > { %v1358_v54 = vpop.f32.mrf.mxu0 }
 0x951   : > { %v1362_v55 = vpack.c.bf16 %v1358_v54, %v1355_v52 }
 0x952   : > { %v2628_v56 = vpop.f32.mrf.mxu0 }
 0x953   : > { %2634 = vmatmul.mubr.msk.bf16.vlgmr.msra.gmra.mxu1 %vm1059_vm4, %v1362_v55 }
 0x954   : > { %v1469_v57 = vpop.f32.mrf.mxu0  ;;  %2645 = vmatprep.mubr.msk.bf16.mxu1 %vm3140_vm0, %v3139_v1 }
 0x955   : > { %v1476_v58 = vsel %vm1107_vm5, %v1469_v57, -inf }
 0x956   : > { %1477 = vmax.xlane.f32.xlu1 %v1476_v58  ;;  %v2641_v59 = vpop.f32.mrf.mxu0 }
 0x958   : > { %v1472_v60 = vpop.f32.mrf.mxu0 }
 0x959   : > { %v1479_v61 = vsel %vm1107_vm5, %v1472_v60, -inf }
 0x95a   : > { %1480 = vmax.xlane.f32.xlu0 %v1479_v61  ;;  %v2642_v62 = vpop.f32.mrf.mxu0 }
 0x9df   : > { %v1478_v63 = vpop.xlane.xlu1 %1477 }
 0x9e0   : > { %v1482_v2 = vsub.f32 %v1469_v57, %v1478_v63 }
 0x9e2   : > { %v1484_v3 = vmul.f32 1.442695, %v1482_v2 }
 0x9e3   : > { %v1481_v4 = vpop.xlane.xlu0 %1480 }
 0x9e4   : > { %2891 = vpow2.f32 %v1484_v3  ;;  %v1483_v5 = vsub.f32 %v1472_v60, %v1481_v4 }
 0x9e6   : > { %v1486_v6 = vmul.f32 1.442695, %v1483_v5 }
 0x9e8   : > { %2893 = vpow2.f32 %v1486_v6 }
 0x9f1   : > { %v2892_v7 = vpop.eup %2891 }
 0x9f2   : > { %v1488_v8 = vsel %vm1107_vm5, %v2892_v7, 0.0 }
 0x9f3   : > { %1489 = vadd.xlane.f32.xlu0 %v1488_v8 }
 0x9f5   : > { %v2894_v11 = vpop.eup %2893 }
 0x9f6   : > { %v1491_v15 = vsel %vm1107_vm5, %v2894_v11, 0.0 }
 0x9f7   : > { %1492 = vadd.xlane.f32.xlu1 %v1491_v15 }
 0xa08   : > { %1611 = vrot.lane.b32.xlu1 %v3440_v34, %s3144_s22 }
 0xa09   : > { %1499 = vrot.lane.b32.xlu0 %v3447_v39, %s3143_s24 }
 0xa0c   : > { %1609 = vrot.lane.b32.xlu1 %v3438_v33, %s3144_s22 }
 0xa13   : > { %v1416_v21 = vpop.f32.mrf.mxu1 }
 0xa14   : > { %v3516_v22 = vadd.f32 %v1416_v21, %v1236_v20  ;;  %v2830_v20 = vld [vmem:[#allocation7 + $0x30] sm:$0xff]  }
 0xa15   : > { %v2635_v12 = vpop.f32.mrf.mxu1 }
 0xa17   : > { %v1419_v24 = vpop.f32.mrf.mxu1 }
 0xa18   : > { %v3519_v34 = vadd.f32 %v1419_v24, %v1237_v23 }
 0xa19   : > { %v2636_v25 = vpop.f32.mrf.mxu1 }
 0xa7c   : > { %v1490_v26 = vpop.xlane.xlu0 %1489 }
 0xa7d   : > { %2895 = vrcp.f32 %v1490_v26 }
 0xa80   : > { %v1493_v27 = vpop.xlane.xlu1 %1492  ;;  %v1500_v33 = vpop.permute.xlu0 %1499 }
 0xa81   : > { %2897 = vrcp.f32 %v1493_v27  ;;  %2644 = vmatpush3.bf16.msra.mxu1 %v1500_v33 }
 0xa82   : > { %2657 = vmatprep.subr.bf16.mxu1 %v3139_v1 }
 0xa84   : > { %v1612_v31 = vpop.permute.xlu1 %1611 }
 0xa85   : > { %v1617_v19 = vsel %vm1059_vm4, %v1612_v31, 0 }
 0xa88   : > { %v1610_v35 = vpop.permute.xlu1 %1609 }
 0xa8a   : > { %v2896_v28 = vpop.eup %2895 }
 0xa8b   : > { %v1496_v29 = vmul.f32 %v2896_v28, %v2892_v7 }
 0xa8e   : > { %v2898_v16 = vpop.eup %2897 }
 0xa8f   : > { %v1497_v30 = vmul.f32 %v2898_v16, %v2894_v11  ;;  %v2831_v16 = vld [vmem:[#allocation8 + $0x70] ss:$8 sps:$4 sm:$0xff]  }
 0xa91   : > { %v1498_v32 = vpack.c.bf16 %v1497_v30, %v1496_v29  ;;  %v2833_v29 = vld [vmem:[#allocation8 + $0x74] ss:$8 sps:$4 sm:$0xff]  }
 0xa93   : > { %2646 = vmatmul.mubr.msk.bf16.vlgmr.msra.gmra.mxu1 %vm1107_vm5, %v1498_v32 }
 0xa94   : > { %2658 = vmatpush3.bf16.xpose.msra.mxu1 %v1617_v19  ;;  %2659 = vmatprep.mubr.msk.bf16.mxu1 %vm3140_vm0, %v3139_v1 }
 0xa95   : > { %2669 = vmatprep.subr.bf16.mxu1 %v3139_v1 }
 0xa9b   : > { %2660 = vmatmul.mubr.msk.bf16.vlgmr.msra.gmra.mxu1 %vm1059_vm4, %v1610_v35 }
 0xa9c   : > { %2673 = vmatprep.mubr.msk.bf16.mxu1 %vm3140_vm0, %v3139_v1  ;;  %2670 = vmatpush3.bf16.msra.mxu1 %v2829_v18  ;;  %v2860_v18 = vld [vmem:[#allocation10 + $0x28] sm:$0xff]  }
 0xa9d   : > { %2671 = vmatprep.subr.bf16.mxu1 %v3139_v1 }
 0xaa0   : > { %2672 = vmatpush3.bf16.msra.mxu1 %v2830_v20  ;;  %v2861_v20 = vld [vmem:[#allocation10 + $0x60] sm:$0xff]  }
 0xb53   : > { %v1539_v38 = vpop.f32.mrf.mxu1 }
 0xb55   : > { %v2647_v40 = vpop.f32.mrf.mxu1 }
 0xb56   : > { %v2834_v40 = vld [vmem:[#allocation8 + $0x60] ss:$8 sps:$4 sm:$0xff]  }
 0xb57   : > { %v1542_v41 = vpop.f32.mrf.mxu1 }
 0xb58   : > { %v1546_v42 = vpack.c.bf16 %v1542_v41, %v1539_v38  ;;  %v2836_v38 = vld [vmem:[#allocation8 + $0x64] ss:$8 sps:$4 sm:$0xff]   ;;  %v2837_v41 = vld [vmem:[#allocation8 + $0x50] ss:$8 sps:$4 sm:$0xff]  }
 0xb59   : > { %v2648_v43 = vpop.f32.mrf.mxu1 }
 0xb5a   : > { %2654 = vmatmul.mubr.msk.bf16.vlgmr.msra.gmra.mxu0 %vm1059_vm4, %v1546_v42  ;;  %v2840_v42 = vld [vmem:[#allocation8 + $0x40] ss:$8 sps:$4 sm:$0xff]   ;;  %v2842_v43 = vld [vmem:[#allocation8 + $0x44] ss:$8 sps:$4 sm:$0xff]  }
 0xb5b   : > { %v1653_v44 = vpop.f32.mrf.mxu1  ;;  %2665 = vmatprep.mubr.msk.bf16.mxu0 %vm3140_vm0, %v3139_v1 }
 0xb5c   : > { %v1660_v45 = vsel %vm1107_vm5, %v1653_v44, -inf }
 0xb5d   : > { %1661 = vmax.xlane.f32.xlu0 %v1660_v45  ;;  %v2661_v46 = vpop.f32.mrf.mxu1  ;;  %v2843_v45 = vld [vmem:[#allocation8 + $0x30] ss:$8 sps:$4 sm:$0xff]  }
 0xb5e   : > { %v2848_v46 = vld [vmem:[#allocation8 + $0x24] ss:$8 sps:$4 sm:$0xff]  }
 0xb5f   : > { %v1656_v47 = vpop.f32.mrf.mxu1 }
 0xb60   : > { %v1663_v48 = vsel %vm1107_vm5, %v1656_v47, -inf }
 0xb61   : > { %1664 = vmax.xlane.f32.xlu1 %v1663_v48  ;;  %v2662_v49 = vpop.f32.mrf.mxu1  ;;  %v2851_v48 = vld [vmem:[#allocation8 + $0x14] ss:$8 sps:$4 sm:$0xff]  }
 0xb62   : > { %v2849_v49 = vld [vmem:[#allocation8 + $0x10] ss:$8 sps:$4 sm:$0xff]  }
 0xb72   : > { %1683 = vrot.lane.b32.xlu1 %v3447_v39, %s3144_s22  ;;  %s2385_s22 = sshll.u32 %s612_s21, 4 }
 0xb73   : > { %s614_s20 = scalar_lea.vmem [#allocation11], %s2385_s22  ;;  %s3057_s22 = sshll.u32 %s3145_s28, 4  ;;  %s3058_s22 = int_to_ptr.vmem [resolvable:$false] %s3057_s22 }
 0xb74   : > { %s2259_s17 = sshll.u32 %s614_s20, 4  ;;  %s3059_s30 = scalar_lea.vmem %s3058_s22, 512  ;;  %s3586_s17 = int_to_ptr.vmem [resolvable:$true] %s2259_s17 }
 0xb75   : > { %s3053_s24 = scalar_lea.vmem %s3586_s17, 256  ;;  %p3060_p11 = scmp.lt.s32.totalorder %s3586_s17, %s3058_s22 }
 0xb76   : > { %p3054_p6 = scmp.ne.s32.totalorder %s3586_s17, %s3053_s24  ;;  %p3061_p0 = scmp.lt.s32.totalorder %s3059_s30, %s3053_s24 }
 0xb78   : > { %p3055_p7 = pnand %p3054_p6, %p3682_p5  ;;  %p3062_p1 = por %p3061_p0, %p3060_p11 }
 0xb7a   : > { %p3056_p8 = pneg %p3055_p7 }
 0xb7c   : > { %p3063_p13 = pnand %p3062_p1, %p3056_p8 }
 0xbe6   : > { %v1662_v50 = vpop.xlane.xlu0 %1661 }
 0xbe7   : > { %v1666_v51 = vsub.f32 %v1653_v44, %v1662_v50  ;;  %v2845_v44 = vld [vmem:[#allocation8 + $0x34] ss:$8 sps:$4 sm:$0xff]   ;;  %v2854_v50 = vld [vmem:[#allocation8 + $0x4] ss:$8 sps:$4 sm:$0xff]  }
 0xbe9   : > { %v1668_v52 = vmul.f32 1.442695, %v1666_v51  ;;  %v2852_v51 = vld [vmem:[#allocation8] ss:$8 sps:$4 sm:$0xff]  }
 0xbea   : > { %v1665_v53 = vpop.xlane.xlu1 %1664 }
 0xbeb   : > { %2899 = vpow2.f32 %v1668_v52  ;;  %v1667_v54 = vsub.f32 %v1656_v47, %v1665_v53  ;;  %v2846_v47 = vld [vmem:[#allocation8 + $0x20] ss:$8 sps:$4 sm:$0xff]  }
 0xbed   : > { %v1670_v55 = vmul.f32 1.442695, %v1667_v54 }
 0xbee   : > { %v1684_v56 = vpop.permute.xlu1 %1683 }
 0xbef   : > { %2901 = vpow2.f32 %v1670_v55  ;;  %2664 = vmatpush3.bf16.msra.mxu0 %v1684_v56 }
 0xbf0   : > { %1944 = vmatprep.subr.bf16.mxu0 %v2833_v29 }
 0xbf8   : > { %v2900_v57 = vpop.eup %2899 }
 0xbf9   : > { %v1672_v58 = vsel %vm1107_vm5, %v2900_v57, 0.0 }
 0xbfa   : > { %1673 = vadd.xlane.f32.xlu0 %v1672_v58 }
 0xbfc   : > { %v2902_v59 = vpop.eup %2901 }
 0xbfd   : > { %v1675_v60 = vsel %vm1107_vm5, %v2902_v59, 0.0 }
 0xbfe   : > { %1676 = vadd.xlane.f32.xlu0 %v1675_v60  ;;  %v2445_v60 = vld [vmem:[%s3637_s9] ss:$0 sm:$0xff] }
 0xc1a   : > { %v1600_v61 = vpop.f32.mrf.mxu0 }
 0xc1b   : > { %v1607_v39 = vadd.f32 %v1600_v61, %v3516_v22 }
 0xc1c   : > { %v2655_v62 = vpop.f32.mrf.mxu0 }
 0xc1e   : > { %v1603_v63 = vpop.f32.mrf.mxu0 }
 0xc1f   : > { %v1608_v2 = vadd.f32 %v1603_v63, %v3519_v34  ;;  %v2446_v63 = vld [vmem:[%s3638_s10] ss:$0 sm:$0xff] }
 0xc20   : > { %v2656_v3 = vpop.f32.mrf.mxu0 }
 0xc83   : > { %v1674_v4 = vpop.xlane.xlu0 %1673 }
 0xc84   : > { %2903 = vrcp.f32 %v1674_v4 }
 0xc87   : > { %v1677_v5 = vpop.xlane.xlu0 %1676 }
 0xc88   : > { %2905 = vrcp.f32 %v1677_v5 }
 0xc91   : > { %v2904_v6 = vpop.eup %2903 }
 0xc92   : > { %v1680_v8 = vmul.f32 %v2904_v6, %v2900_v57  ;;  %v2855_v6 = vld [vmem:[#allocation10 + $0x78] sm:$0xff]  }
 0xc93   : > { %2535 = vmatprep.subr.bf16.mxu1 %v2855_v6 }
 0xc95   : > { %v2906_v7 = vpop.eup %2905 }
 0xc96   : > { %v1681_v11 = vmul.f32 %v2906_v7, %v2902_v59  ;;  %v2856_v7 = vld [vmem:[#allocation10 + $0x38] sm:$0xff]  }
 0xc98   : > { %v1682_v15 = vpack.c.bf16 %v1681_v11, %v1680_v8  ;;  %v2857_v8 = vld [vmem:[#allocation10 + $0x70] sm:$0xff]  }
 0xc99   : > { %v2858_v11 = vld [vmem:[#allocation10 + $0x30] sm:$0xff]  }
 0xc9a   : > { %2666 = vmatmul.mubr.msk.bf16.vlgmr.msra.gmra.mxu0 %vm1107_vm5, %v1682_v15  ;;  %v2859_v15 = vld [vmem:[#allocation10 + $0x68] sm:$0xff]  }
 0xc9b   : > { %1976 = vmatprep.mubr.bf16.mxu0 %v3138_v0  ;;  %1945 = vmatpush1.bf16.msra.mxu0 %v2831_v16 }
 0xc9c   : > { %1946 = vmatprep.subr.bf16.mxu0 %v2836_v38 }
 0xc9f   : > { %1947 = vmatpush1.bf16.msra.mxu0 %v2834_v40 }
 0xd5a   : > { %v1723_v21 = vpop.f32.mrf.mxu0 }
 0xd5c   : > { %v2667_v22 = vpop.f32.mrf.mxu0 }
 0xd5d   : > { %v2863_v22 = vld [vmem:[#allocation10 + $0x58] sm:$0xff]  }
 0xd5e   : > { %v1726_v12 = vpop.f32.mrf.mxu0 }
 0xd5f   : > { %v1730_v23 = vpack.c.bf16 %v1726_v12, %v1723_v21  ;;  %v2862_v21 = vld [vmem:[#allocation10 + $0x20] sm:$0xff]   ;;  %v2864_v12 = vld [vmem:[#allocation10 + $0x18] sm:$0xff]  }
 0xd60   : > { %v2668_v24 = vpop.f32.mrf.mxu0 }
 0xd61   : > { %2674 = vmatmul.mubr.msk.bf16.vlgmr.msra.gmra.mxu1 %vm1059_vm4, %v1730_v23  ;;  %v2865_v23 = vld [vmem:[#allocation10 + $0x50] sm:$0xff]  }
 0xd62   : > { %2536 = vmatpush3.bf16.msra.mxu1 %v2856_v7  ;;  %v2866_v24 = vld [vmem:[#allocation10 + $0x10] sm:$0xff]  }
 0xd63   : > { %2537 = vmatprep.subr.bf16.mxu1 %v2857_v8 }
 0xd66   : > { %2538 = vmatpush3.bf16.msra.mxu1 %v2858_v11 }
 0xd67   : > { %2539 = vmatprep.subr.bf16.mxu1 %v2859_v15  ;;  %v2463_v15 = vld [vmem:[%s3642_s14] ss:$0 sm:$0xff] }
 0xd6a   : > { %2540 = vmatpush3.bf16.msra.mxu1 %v2860_v18 }
 0xd6b   : > { %2541 = vmatprep.subr.bf16.mxu1 %v2861_v20 }
 0xd6e   : > { %2542 = vmatpush3.bf16.msra.mxu1 %v2862_v21 }
 0xd6f   : > { %2543 = vmatprep.subr.bf16.mxu1 %v2863_v22 }
 0xd72   : > { %2544 = vmatpush3.bf16.msra.mxu1 %v2864_v12 }
 0xd73   : > { %2545 = vmatprep.subr.bf16.mxu1 %v2865_v23 }
 0xd76   : > { %2546 = vmatpush3.bf16.msra.mxu1 %v2866_v24 }
 0xe21   : > { %v1784_v34 = vpop.f32.mrf.mxu1 }
 0xe22   : > { %v1791_v25 = vadd.f32 %v1784_v34, %v1607_v39  ;;  %v2867_v34 = vld [vmem:[#allocation10 + $0x48] sm:$0xff]  }
 0xe23   : > { %v2675_v26 = vpop.f32.mrf.mxu1  ;;  %2547 = vmatprep.subr.bf16.mxu1 %v2867_v34 }
 0xe24   : > { %v1793_v27 = vadd.f32 %v1791_v25, %v3415_v9  ;;  %v2868_v25 = vld [vmem:[#allocation10 + $0x8] sm:$0xff]   ;;  %v2869_v26 = vld [vmem:[#allocation10 + $0x40] sm:$0xff]  }
 0xe25   : > { %v1787_v33 = vpop.f32.mrf.mxu1  ;;  %2548 = vmatpush3.bf16.msra.mxu1 %v2868_v25 }
 0xe26   : > { %v1792_v0 = vadd.f32 %v1787_v33, %v1608_v2  ;;  %1797 = vadd.xlane.f32.xlu0 %v1793_v27  ;;  %2549 = vmatprep.subr.bf16.mxu1 %v2869_v26  ;;  %v1852_v33 = vld [vmem:[%s3640_s12] sm:$0x3] }
 0xe27   : > { %v2676_v28 = vpop.f32.mrf.mxu1 }
 0xe28   : > { %v1794_v1 = vadd.f32 %v1792_v0, %v3417_v10  ;;  %v2839_v10 = vld [vmem:[#allocation8 + $0x54] ss:$8 sps:$4 sm:$0xff]   ;;  %v1857_v0 = vrot.slane %v1852_v33, %v821_v14  ;;  %v1861_v28 = vrot.slane %v1852_v33, %v825_v17 }
 0xe29   : > { %1948 = vmatprep.subr.bf16.mxu0 %v2839_v10 }
 0xe2a   : > { %1799 = vadd.xlane.f32.xlu0 %v1794_v1  ;;  %1949 = vmatpush1.bf16.msra.mxu0 %v2837_v41 }
 0xe2b   : > { %1950 = vmatprep.subr.bf16.mxu0 %v2842_v43 }
 0xe2e   : > { %1951 = vmatpush1.bf16.msra.mxu0 %v2840_v42 }
 0xe2f   : > { %1952 = vmatprep.subr.bf16.mxu0 %v2845_v44 }
 0xe32   : > { %1953 = vmatpush1.bf16.msra.mxu0 %v2843_v45 }
 0xe33   : > { %1954 = vmatprep.subr.bf16.mxu0 %v2848_v46 }
 0xe36   : > { %1955 = vmatpush1.bf16.msra.mxu0 %v2846_v47 }
 0xe37   : > { %1956 = vmatprep.subr.bf16.mxu0 %v2851_v48 }
 0xe3a   : > { %1957 = vmatpush1.bf16.msra.mxu0 %v2849_v49 }
 0xe3b   : > { %1958 = vmatprep.subr.bf16.mxu0 %v2854_v50 }
 0xe3e   : > { %1959 = vmatpush1.bf16.msra.mxu0 %v2852_v51 }
 0xeaf   : > { %v1798_v30 = vpop.xlane.xlu0 %1797 }
 0xeb0   : > { %v1801_v31 = vmul.f32 0.0078125, %v1798_v30 }
 0xeb2   : > { %v1803_v32 = vsub.f32 %v1793_v27, %v1801_v31  ;;  %v2870_v27 = vld [vmem:[#allocation10] sm:$0xff]  }
 0xeb3   : > { %v1800_v19 = vpop.xlane.xlu0 %1799  ;;  %2550 = vmatpush3.bf16.msra.mxu1 %v2870_v27 }
 0xeb4   : > { %v1802_v35 = vmul.f32 0.0078125, %v1800_v19  ;;  %v1805_v36 = vmul.f32 %v1803_v32, %v1803_v32 }
 0xeb6   : > { %v1804_v37 = vsub.f32 %v1794_v1, %v1802_v35  ;;  %1807 = vadd.xlane.f32.xlu0 %v1805_v36 }
 0xeb8   : > { %v1806_v9 = vmul.f32 %v1804_v37, %v1804_v37 }
 0xeba   : > { %1809 = vadd.xlane.f32.xlu0 %v1806_v9 }
 0xf3f   : > { %v1808_v52 = vpop.xlane.xlu0 %1807 }
 0xf40   : > { %v1811_v53 = vmul.f32 0.0078125, %v1808_v52 }
 0xf42   : > { %v1813_v54 = vadd.f32 1e-05, %v1811_v53 }
 0xf43   : > { %v1810_v55 = vpop.xlane.xlu0 %1809 }
 0xf44   : > { %2907 = vrsqrt.f32 %v1813_v54  ;;  %v1812_v56 = vmul.f32 0.0078125, %v1810_v55 }
 0xf46   : > { %v1814_v57 = vadd.f32 1e-05, %v1812_v56 }
 0xf48   : > { %2909 = vrsqrt.f32 %v1814_v57 }
 0xf51   : > { %v2908_v58 = vpop.eup %2907 }
 0xf52   : > { %v1817_v59 = vmul.f32 %v2908_v58, %v1803_v32 }
 0xf54   : > { %v1825_v62 = vmul.f32 %v2445_v60, %v1817_v59 }
 0xf55   : > { %v2910_v61 = vpop.eup %2909 }
 0xf56   : > { %v1818_v39 = vmul.f32 %v2910_v61, %v1804_v37  ;;  %v3555_v3 = vadd.f32 %v2446_v63, %v1825_v62 }
 0xf58   : > { %v1826_v2 = vmul.f32 %v2445_v60, %v1818_v39 }
 0xf5a   : > { %v3557_v4 = vadd.f32 %v2446_v63, %v1826_v2 }
 0xf5c   : > { %v1835_v5 = vpack.c.bf16 %v3557_v4, %v3555_v3 }
 0xf5e   : > { %1977 = vmatmul.mubr.bf16.vlgmr.msra.gmra.mxu0 %v1835_v5 }
0x101e   : > { %v1978_v1 = vpop.f32.mrf.mxu0 }
0x101f   : > { %v1979_v16 = vadd.f32 %v1978_v1, %v1857_v0 }
0x1020   : > { %v1980_v29 = vpop.f32.mrf.mxu0 }
0x1021   : > { %v1987_v30 = vmul.f32 %v1979_v16, %v1979_v16  ;;  %v1981_v31 = vadd.f32 %v1980_v29, %v1861_v28 }
0x1022   : > { %v1982_v32 = vpop.f32.mrf.mxu0 }
0x1023   : > { %v1991_v19 = vmul.f32 %v1987_v30, %v1979_v16  ;;  %v1988_v35 = vmul.f32 %v1981_v31, %v1981_v31  ;;  %v1983_v36 = vadd.f32 %v1982_v32, %v1857_v0 }
0x1024   : > { %v1984_v37 = vpop.f32.mrf.mxu0 }
0x1025   : > { %v1995_v9 = vmul.f32 0.044715, %v1991_v19  ;;  %v1992_v38 = vmul.f32 %v1988_v35, %v1981_v31  ;;  %v1989_v40 = vmul.f32 %v1983_v36, %v1983_v36  ;;  %v1985_v10 = vadd.f32 %v1984_v37, %v1861_v28 }
0x1027   : > { %v1999_v41 = vadd.f32 %v1995_v9, %v1979_v16  ;;  %v1996_v42 = vmul.f32 0.044715, %v1992_v38  ;;  %v1993_v14 = vmul.f32 %v1989_v40, %v1983_v36  ;;  %v1990_v43 = vmul.f32 %v1985_v10, %v1985_v10  ;;  %v2481_v9 = vld [vmem:[%s3644_s16] ss:$0 sm:$0xff] }
0x1029   : > { %v2003_v13 = vmul.f32 0.7978846, %v1999_v41  ;;  %v2000_v17 = vadd.f32 %v1996_v42, %v1981_v31  ;;  %v1997_v44 = vmul.f32 0.044715, %v1993_v14  ;;  %v1994_v45 = vmul.f32 %v1990_v43, %v1985_v10 }
0x102b   : > { %v2004_v46 = vmul.f32 0.7978846, %v2000_v17  ;;  %v2001_v47 = vadd.f32 %v1997_v44, %v1983_v36  ;;  %v1998_v48 = vmul.f32 0.044715, %v1994_v45  ;;  %2911 = vtanh.f32 %v2003_v13 }
0x102d   : > { %2913 = vtanh.f32 %v2004_v46  ;;  %v2005_v49 = vmul.f32 0.7978846, %v2001_v47  ;;  %v2002_v50 = vadd.f32 %v1998_v48, %v1985_v10 }
0x102f   : > { %2915 = vtanh.f32 %v2005_v49  ;;  %v2006_v51 = vmul.f32 0.7978846, %v2002_v50 }
0x1031   : > { %2917 = vtanh.f32 %v2006_v51 }
0x1038   : > { %v2912_v52 = vpop.eup %2911 }
0x1039   : > { %v2011_v56 = vadd.f32 1.0, %v2912_v52 }
0x103a   : > { %v2914_v53 = vpop.eup %2913 }
0x103b   : > { %v2012_v54 = vadd.f32 1.0, %v2914_v53  ;;  %v2015_v39 = vmul.f32 0.5, %v2011_v56 }
0x103c   : > { %v2916_v55 = vpop.eup %2915 }
0x103d   : > { %v2013_v57 = vadd.f32 1.0, %v2916_v55  ;;  %v2016_v61 = vmul.f32 0.5, %v2012_v54  ;;  %v2019_v6 = vmul.f32 %v2015_v39, %v1979_v16 }
0x103e   : > { %v2918_v58 = vpop.eup %2917 }
0x103f   : > { %v2017_v59 = vmul.f32 0.5, %v2013_v57  ;;  %v2014_v60 = vadd.f32 1.0, %v2918_v58  ;;  %v2020_v2 = vmul.f32 %v2016_v61, %v1981_v31 }
0x1041   : > { %v2018_v62 = vmul.f32 0.5, %v2014_v60  ;;  %v2021_v63 = vmul.f32 %v2017_v59, %v1983_v36  ;;  %v2480_v36 = vld [vmem:[%s3643_s15] ss:$0 sm:$0xff] }
0x1043   : > { %v2022_v5 = vmul.f32 %v2018_v62, %v1985_v10  ;;  %v2023_v8 = vpack.c.bf16 %v2021_v63, %v2019_v6 }
0x1045   : > { %v2024_v7 = vpack.c.bf16 %v2022_v5, %v2020_v2 }
0x1047   : > { %2192 = vmatprep.mubr.bf16.mxu1 %v2024_v7 }
0x1048   : > { %2193 = vmatmul.mubr.bf16.vlgmr.msra.gmra.mxu1 %v2023_v8 }
0x1108   : > { %v2551_v11 = vpop.f32.mrf.mxu1 }
0x110a   : > { %v2552_v18 = vpop.f32.mrf.mxu1 }
0x110b   : > { %v2553_v20 = vadd.f32 %v2552_v18, %v2551_v11 }
0x110c   : > { %v2554_v21 = vpop.f32.mrf.mxu1 }
0x110d   : > { %v2195_v22 = vadd.f32 %v2553_v20, %v2463_v15 }
0x110e   : > { %v2555_v12 = vpop.f32.mrf.mxu1 }
0x110f   : > { %v2556_v23 = vadd.f32 %v2555_v12, %v2554_v21  ;;  %v2201_v24 = vadd.f32 %v2195_v22, %v3555_v3 }
0x1111   : > { %v2198_v34 = vadd.f32 %v2556_v23, %v2463_v15  ;;  %2205 = vadd.xlane.f32.xlu1 %v2201_v24 }
0x1113   : > { %v2202_v25 = vadd.f32 %v2198_v34, %v3557_v4 }
0x1115   : > { %2207 = vadd.xlane.f32.xlu0 %v2202_v25 }
0x119a   : > { %v2206_v26 = vpop.xlane.xlu1 %2205 }
0x119b   : > { %v2209_v27 = vmul.f32 0.0078125, %v2206_v26 }
0x119d   : > { %v2211_v33 = vsub.f32 %v2201_v24, %v2209_v27 }
0x119e   : > { %v2208_v0 = vpop.xlane.xlu0 %2207 }
0x119f   : > { %v2210_v28 = vmul.f32 0.0078125, %v2208_v0  ;;  %v2213_v1 = vmul.f32 %v2211_v33, %v2211_v33 }
0x11a1   : > { %v2212_v16 = vsub.f32 %v2202_v25, %v2210_v28  ;;  %2215 = vadd.xlane.f32.xlu0 %v2213_v1 }
0x11a3   : > { %v2214_v29 = vmul.f32 %v2212_v16, %v2212_v16 }
0x11a5   : > { %2217 = vadd.xlane.f32.xlu0 %v2214_v29 }
0x122a   : > { %v2216_v30 = vpop.xlane.xlu0 %2215 }
0x122b   : > { %v2219_v31 = vmul.f32 0.0078125, %v2216_v30 }
0x122d   : > { %v2221_v32 = vadd.f32 1e-05, %v2219_v31 }
0x122e   : > { %v2218_v3 = vpop.xlane.xlu0 %2217 }
0x122f   : > { %2919 = vrsqrt.f32 %v2221_v32  ;;  %v2220_v19 = vmul.f32 0.0078125, %v2218_v3 }
0x1231   : > { %v2222_v4 = vadd.f32 1e-05, %v2220_v19 }
0x1233   : > { %2921 = vrsqrt.f32 %v2222_v4 }
0x123c   : > { %v2920_v35 = vpop.eup %2919 }
0x123d   : > { %v2225_v37 = vmul.f32 %v2920_v35, %v2211_v33 }
0x123f   : > { %v2233_v38 = vmul.f32 %v2480_v36, %v2225_v37 }
0x1240   : > { %v2922_v40 = vpop.eup %2921 }
0x1241   : > { %v2241_v10 = vadd.f32 %v2481_v9, %v2233_v38  ;;  %v2226_v41 = vmul.f32 %v2922_v40, %v2212_v16 }
0x1243   : > { %v2234_v42 = vmul.f32 %v2480_v36, %v2226_v41  ;;  %2243 = vst [vmem:[%s614_s20] sm:$0xff] %v2241_v10 }
0x1245   : > { %v2242_v14 = vadd.f32 %v2481_v9, %v2234_v42 }
0x1247   : > { %2244 = vst [vmem:[%s614_s20 + $0x8] sm:$0xff] %v2242_v14 }
0x1248   : > { %3066 = shalt.err (!%p3063_p13)
}
0x1249   : > { %s3067_s21 = scalar_lea.hbm %s3584_s19, 256  ;;  %s3071_s20 = scalar_lea.hbm %s3681_s18, 512 }
0x124a   : > { %p3068_p3 = scmp.ne.s32.totalorder %s3584_s19, %s3067_s21  ;;  %p3072_p4 = scmp.lt.s32.totalorder %s3584_s19, %s3681_s18 }
0x124b   : > { %p3073_p12 = scmp.lt.s32.totalorder %s3071_s20, %s3067_s21 }
0x124c   : > { %p3069_p2 = pnand %p3068_p3, %p3682_p5 }
0x124d   : > { %p3074_p10 = por %p3073_p12, %p3072_p4 }
0x124e   : > { %p3070_p9 = pneg %p3069_p2 }
0x1250   : > { %p3075_p6 = pnand %p3074_p10, %p3070_p9 }
0x1252   : > { %3078 = shalt.err (!%p3075_p6)
}
0x1253   : > { %s3146_s24 = smov 128   ;;  %s3147_s28 = smov 8  }
0x1254   : > { %2697 = dma.vmem_to_hbm [thread:$0]  (%p3682_p5), %s3586_s17, 256, %s3584_s19, %s3588_s29, %s3146_s24, %s3146_s24, %s3147_s28  }
0x1255 PF: > { %s3683_s22 = sld [smem:[#allocation18_spill]] }
0x1256   : > { %s3684_s30 = sld [smem:[#allocation16_spill]] }
0x1257   : > { %s3685_s26 = sld [smem:[#allocation22_spill]] }
0x125b   : > { %p2729_p7 = scmp.ge.s32.totalorder %s3683_s22, 2 }
0x125c   : > { %s2274_s23 = sand.u32 1, %s3684_s30  }
0x125d   : > { %p3686_p8 = scmp.ne.s32.totalorder %s3685_s26, 0  ;;  %s2275_s21 = scalar_lea.sflag [#allocation4], %s2274_s23 }
0x125f   : > { %p2716_p11 = pnand %p2729_p7, %p3686_p8 }
0x1261   : > { %p2717_p0 = pneg %p2716_p11 }
0x1263   : > { %3108 = dma.done.wait (%p2717_p0), %s2275_s21, 256  }
0x1264   : > { %3110 = vsyncadd (%p2717_p0), %s2275_s21, 4294967040  ;;  %s3687_s27 = sld [smem:[#allocation19_spill]]  ;;  %s3690_s24 = smov %s3117_s25 }
0x1265   : > { %s3688_s20 = sld [smem:[#allocation17_spill]] }
0x1266   : > { %s3689_s26 = sld [smem:[#allocation20_spill]] }
0x126a   : > { %p30_p1 = scmp.ge.s32.totalorder %s3687_s27, 4  }
0x126b   : > { %s3691_s25 = smov %s3688_s20 }
0x126c   :  { %32 = sbr.rel (!%p30_p1) target bundleno = 10 (0xa), region = 144 }
0x1271   :  { %2280 = vsyncpa [#allocation3], 1 }
0x1272   :  { %2282 = vsyncpa [#allocation3 + $0x1], 1 }
0x1273   :  { %2283 = vsyncpa [#allocation6], 1 }
0x1274   :  { %2284 = vsyncpa [#allocation9], 1 }
0x1275   :  { %2285 = vsyncpa [#allocation4], 1 }
0x1276   :  { %2287 = vsyncpa [#allocation4 + $0x1], 1 }

</bundles_post_ra>
